<compile_context>
chip_gen: v7x
topology: tpu7x:2x2x1
jax: 0.10.0
libtpu: 0.0.40
codegen_flags: <defaults>
</compile_context>

<pallas_src>
import jax
import jax.numpy as jnp
from jax.experimental import pallas as pl
from jax.experimental.pallas import tpu as pltpu


# ----------------------------------------------------------------------------
# Fused ResNetBlock kernel (one grid step == one batch element, (C, H*W) view).
# ----------------------------------------------------------------------------
def _make_resblock_kernel(H, W):
    HW = H * W
    Ho, Wo = H - 1, W - 1          # conv1 valid-output extent
    KH, KW = 2, 2

    def shift(a, d):
        # result[:, p] = a[:, (p + d) % HW]  (circular; wrapped lanes are
        # always masked out via the interior mask below).
        s = (-d) % HW
        return pltpu.roll(a, shift=s, axis=1) if s else a

    def kernel(x_ref, w1_ref, b1_ref, w2_ref, b2_ref, out_ref):
        C = x_ref.shape[0]
        x = x_ref[...]                                        # (C, HW) f32

        # Mask of conv1's valid (Ho, Wo) interior inside the full H*W grid.
        pos = jax.lax.broadcasted_iota(jnp.int32, (C, HW), 1)
        interior = jnp.logical_and(pos < Ho * W, pos % W < Wo)

        hi = jax.lax.Precision.HIGHEST

        # ---- conv1 (k=2, pad=0) + bias + ReLU: one MXU dot per tap ----------
        acc1 = jnp.zeros((C, HW), jnp.float32)
        for kh in range(KH):
            for kw in range(KW):
                acc1 = acc1 + jnp.dot(
                    w1_ref[kh, kw],                           # (Cout, Cin)
                    shift(x, kh * W + kw),                    # (Cin, HW)
                    precision=hi, preferred_element_type=jnp.float32)
        # Zeroing the invalid last row/col == the zero padding conv2 needs.
        h = jnp.where(interior, jnp.maximum(acc1 + b1_ref[...], 0.0), 0.0)

        # ---- conv2 (k=2, pad=1) + bias + residual + ReLU --------------------
        acc2 = jnp.zeros((C, HW), jnp.float32)
        for kh in range(KH):
            for kw in range(KW):
                acc2 = acc2 + jnp.dot(
                    w2_ref[kh, kw],
                    shift(h, (kh - 1) * W + (kw - 1)),
                    precision=hi, preferred_element_type=jnp.float32)

        y = acc2 + b2_ref[...] + x
        out_ref[...] = jnp.maximum(y, 0.0).astype(out_ref.dtype)

    return kernel


# ----------------------------------------------------------------------------
# Wrapper: (B,C,H,W) <-> (B,C,H*W) reshapes only (no transposes), weight prep.
# ----------------------------------------------------------------------------
@jax.jit
def resnet_block_forward(x_nchw, params):
    """ResNetBlock forward. x_nchw: (B, 10, H, W) f32 -> (B, 10, H, W) f32."""
    B, C, H, W = x_nchw.shape
    HW = H * W

    x = x_nchw.reshape(B, C, HW)                      # contiguous reshape, free
    w1 = jnp.transpose(params['c1_w'], (2, 3, 0, 1))  # OIHW -> (KH, KW, Cout, Cin)
    w2 = jnp.transpose(params['c2_w'], (2, 3, 0, 1))
    b1 = params['c1_b'].reshape(C, 1)
    b2 = params['c2_b'].reshape(C, 1)

    y = pl.pallas_call(
        _make_resblock_kernel(H, W),
        out_shape=jax.ShapeDtypeStruct((B, C, HW), x.dtype),
        grid=(B,),
        in_specs=[
            pl.BlockSpec((None, C, HW), lambda n: (n, 0, 0)),     # x (lane-dense)
            pl.BlockSpec((2, 2, C, C), lambda n: (0, 0, 0, 0)),   # w1 (resident)
            pl.BlockSpec((C, 1), lambda n: (0, 0)),               # b1
            pl.BlockSpec((2, 2, C, C), lambda n: (0, 0, 0, 0)),   # w2 (resident)
            pl.BlockSpec((C, 1), lambda n: (0, 0)),               # b2
        ],
        out_specs=pl.BlockSpec((None, C, HW), lambda n: (n, 0, 0)),
        compiler_params=pltpu.CompilerParams(
            dimension_semantics=("parallel",)),
    )(x, w1, b1, w2, b2)

    return y.reshape(B, C, H, W)


# ----------------------------------------------------------------------------
# Pure-JAX reference (PyTorch semantics) for correctness checking.
# ----------------------------------------------------------------------------
def _reference_block(x, params):
    dn = ('NCHW', 'OIHW', 'NCHW')
    hi = jax.lax.Precision.HIGHEST
    h = jax.lax.conv_general_dilated(x, params['c1_w'], (1, 1), 'VALID',
                                     dimension_numbers=dn, precision=hi)
    h = jnp.maximum(h + params['c1_b'][None, :, None, None], 0.0)
    o = jax.lax.conv_general_dilated(h, params['c2_w'], (1, 1),
                                     ((1, 1), (1, 1)),
                                     dimension_numbers=dn, precision=hi)
    o = o + params['c2_b'][None, :, None, None]
    return jnp.maximum(x + o, 0.0)


if __name__ == "__main__":
    key = jax.random.PRNGKey(0)
    kx, k1, k2, k3, k4 = jax.random.split(key, 5)

    # ResNetBlock requires 10 channels; small spatial size.
    B, C, H, W = 2, 10, 16, 16
    x = jax.random.normal(kx, (B, C, H, W), jnp.float32)
    params = {
        'c1_w': 0.1 * jax.random.normal(k1, (10, 10, 2, 2), jnp.float32),  # OIHW
        'c1_b': 0.1 * jax.random.normal(k2, (10,), jnp.float32),
        'c2_w': 0.1 * jax.random.normal(k3, (10, 10, 2, 2), jnp.float32),
        'c2_b': 0.1 * jax.random.normal(k4, (10,), jnp.float32),
    }

    out = resnet_block_forward(x, params)
    out = jax.block_until_ready(out)
    assert out.shape == (B, C, H, W), out.shape
    assert bool(jnp.all(jnp.isfinite(out)))

    ref = _reference_block(x, params)
    err = float(jnp.max(jnp.abs(out - ref)))
    # 1e-3 tolerance: structural bugs give O(0.1..1) errors; MXU f32 multi-pass
    # vs the HIGHEST-precision conv reference is ~1e-6.
    assert bool(jnp.allclose(out, ref, atol=1e-3, rtol=1e-3)), err

    print("KERNEL_OK")
</pallas_src>

<mosaic_0001>
module attributes {stable_mosaic.version = 11 : i64} {
  func.func @kernel(%arg0: i32, %arg1: memref<1x10x256xf32, #tpu.memory_space<vmem>>, %arg2: memref<2x2x10x10xf32, #tpu.memory_space<vmem>>, %arg3: memref<10x1xf32, #tpu.memory_space<vmem>>, %arg4: memref<2x2x10x10xf32, #tpu.memory_space<vmem>>, %arg5: memref<10x1xf32, #tpu.memory_space<vmem>>, %arg6: memref<1x10x256xf32, #tpu.memory_space<vmem>>) attributes {dimension_semantics = [#tpu.dimension_semantics<parallel>], iteration_bounds = array<i64: 2>, scalar_prefetch = 0 : i64, scratch_operands = 0 : i64, tpu.core_type = #tpu.core_type<tc>, window_params = [{transform_indices = @transform_0, window_bounds = array<i64: 1, 10, 256>}, {pipeline_mode = #tpu.pipeline_mode<synchronous>, transform_indices = @transform_1, window_bounds = array<i64: 2, 2, 10, 10>}, {pipeline_mode = #tpu.pipeline_mode<synchronous>, transform_indices = @transform_2, window_bounds = array<i64: 10, 1>}, {pipeline_mode = #tpu.pipeline_mode<synchronous>, transform_indices = @transform_3, window_bounds = array<i64: 2, 2, 10, 10>}, {pipeline_mode = #tpu.pipeline_mode<synchronous>, transform_indices = @transform_4, window_bounds = array<i64: 10, 1>}, {transform_indices = @transform_5, window_bounds = array<i64: 1, 10, 256>}]} {
    %c0 = arith.constant 0 : index
    %c0_0 = arith.constant 0 : index
    %c0_1 = arith.constant 0 : index
    %0 = vector.load %arg1[%c0, %c0_0, %c0_1] : memref<1x10x256xf32, #tpu.memory_space<vmem>>, vector<1x10x256xf32>
    %1 = vector.shape_cast %0 : vector<1x10x256xf32> to vector<10x256xf32>
    %2 = tpu.iota {dimensions = array<i32: 1>} : vector<10x256xi32>
    %c240_i32 = arith.constant 240 : i32
    %3 = vector.broadcast %c240_i32 : i32 to vector<10x256xi32>
    %4 = arith.cmpi slt, %2, %3 : vector<10x256xi32>
    %c16_i32 = arith.constant 16 : i32
    %c0_i32 = arith.constant 0 : i32
    %5 = arith.cmpi eq, %c16_i32, %c0_i32 : i32
    %c1_i32 = arith.constant 1 : i32
    %6 = arith.select %5, %c1_i32, %c16_i32 : i32
    %7 = vector.broadcast %6 : i32 to vector<10x256xi32>
    %8 = arith.remsi %2, %7 : vector<10x256xi32>
    %c0_i32_2 = arith.constant 0 : i32
    %9 = vector.broadcast %c0_i32_2 : i32 to vector<10x256xi32>
    %10 = arith.cmpi ne, %8, %9 : vector<10x256xi32>
    %c0_i32_3 = arith.constant 0 : i32
    %11 = vector.broadcast %c0_i32_3 : i32 to vector<10x256xi32>
    %12 = arith.cmpi slt, %8, %11 : vector<10x256xi32>
    %c0_i32_4 = arith.constant 0 : i32
    %13 = arith.cmpi slt, %6, %c0_i32_4 : i32
    %14 = vector.broadcast %13 : i1 to vector<10x256xi1>
    %15 = vector.broadcast %14 : vector<10x256xi1> to vector<10x256xi1>
    %16 = arith.xori %12, %15 : vector<10x256xi1>
    %17 = arith.andi %16, %10 : vector<10x256xi1>
    %18 = vector.broadcast %6 : i32 to vector<10x256xi32>
    %19 = arith.addi %8, %18 : vector<10x256xi32>
    %20 = arith.select %17, %19, %8 : vector<10x256xi1>, vector<10x256xi32>
    %c15_i32 = arith.constant 15 : i32
    %21 = vector.broadcast %c15_i32 : i32 to vector<10x256xi32>
    %22 = arith.cmpi slt, %20, %21 : vector<10x256xi32>
    %23 = arith.andi %4, %22 : vector<10x256xi1>
    %cst = arith.constant 0.000000e+00 : f32
    %24 = vector.broadcast %cst : f32 to vector<10x256xf32>
    %c0_5 = arith.constant 0 : index
    %c0_6 = arith.constant 0 : index
    %c0_7 = arith.constant 0 : index
    %c0_8 = arith.constant 0 : index
    %25 = vector.load %arg2[%c0_5, %c0_6, %c0_7, %c0_8] : memref<2x2x10x10xf32, #tpu.memory_space<vmem>>, vector<1x1x10x10xf32>
    %26 = vector.shape_cast %25 : vector<1x1x10x10xf32> to vector<10x10xf32>
    %cst_9 = arith.constant dense<0.000000e+00> : vector<10x256xf32>
    %27 = tpu.matmul %26, %1, %cst_9 {dimension_numbers = #tpu.dot_dimension_numbers<[1], [0], [0], [1], [0, 0, 1, 1], [], []>, precision = #tpu.contract_precision<fp32>} : vector<10x10xf32>, vector<10x256xf32>, vector<10x256xf32> -> vector<10x256xf32>
    %28 = arith.addf %24, %27 : vector<10x256xf32>
    %c0_10 = arith.constant 0 : index
    %c1 = arith.constant 1 : index
    %c0_11 = arith.constant 0 : index
    %c0_12 = arith.constant 0 : index
    %29 = vector.load %arg2[%c0_10, %c1, %c0_11, %c0_12] : memref<2x2x10x10xf32, #tpu.memory_space<vmem>>, vector<1x1x10x10xf32>
    %30 = vector.shape_cast %29 : vector<1x1x10x10xf32> to vector<10x10xf32>
    %c255_i32 = arith.constant 255 : i32
    %31 = tpu.dynamic_rotate %1 by %c255_i32 dim 1 : vector<10x256xf32>, i32 -> vector<10x256xf32>
    %cst_13 = arith.constant dense<0.000000e+00> : vector<10x256xf32>
    %32 = tpu.matmul %30, %31, %cst_13 {dimension_numbers = #tpu.dot_dimension_numbers<[1], [0], [0], [1], [0, 0, 1, 1], [], []>, precision = #tpu.contract_precision<fp32>} : vector<10x10xf32>, vector<10x256xf32>, vector<10x256xf32> -> vector<10x256xf32>
    %33 = arith.addf %28, %32 : vector<10x256xf32>
    %c1_14 = arith.constant 1 : index
    %c0_15 = arith.constant 0 : index
    %c0_16 = arith.constant 0 : index
    %c0_17 = arith.constant 0 : index
    %34 = vector.load %arg2[%c1_14, %c0_15, %c0_16, %c0_17] : memref<2x2x10x10xf32, #tpu.memory_space<vmem>>, vector<1x1x10x10xf32>
    %35 = vector.shape_cast %34 : vector<1x1x10x10xf32> to vector<10x10xf32>
    %c240_i32_18 = arith.constant 240 : i32
    %36 = tpu.dynamic_rotate %1 by %c240_i32_18 dim 1 : vector<10x256xf32>, i32 -> vector<10x256xf32>
    %cst_19 = arith.constant dense<0.000000e+00> : vector<10x256xf32>
    %37 = tpu.matmul %35, %36, %cst_19 {dimension_numbers = #tpu.dot_dimension_numbers<[1], [0], [0], [1], [0, 0, 1, 1], [], []>, precision = #tpu.contract_precision<fp32>} : vector<10x10xf32>, vector<10x256xf32>, vector<10x256xf32> -> vector<10x256xf32>
    %38 = arith.addf %33, %37 : vector<10x256xf32>
    %c1_20 = arith.constant 1 : index
    %c1_21 = arith.constant 1 : index
    %c0_22 = arith.constant 0 : index
    %c0_23 = arith.constant 0 : index
    %39 = vector.load %arg2[%c1_20, %c1_21, %c0_22, %c0_23] : memref<2x2x10x10xf32, #tpu.memory_space<vmem>>, vector<1x1x10x10xf32>
    %40 = vector.shape_cast %39 : vector<1x1x10x10xf32> to vector<10x10xf32>
    %c239_i32 = arith.constant 239 : i32
    %41 = tpu.dynamic_rotate %1 by %c239_i32 dim 1 : vector<10x256xf32>, i32 -> vector<10x256xf32>
    %cst_24 = arith.constant dense<0.000000e+00> : vector<10x256xf32>
    %42 = tpu.matmul %40, %41, %cst_24 {dimension_numbers = #tpu.dot_dimension_numbers<[1], [0], [0], [1], [0, 0, 1, 1], [], []>, precision = #tpu.contract_precision<fp32>} : vector<10x10xf32>, vector<10x256xf32>, vector<10x256xf32> -> vector<10x256xf32>
    %43 = arith.addf %38, %42 : vector<10x256xf32>
    %c0_25 = arith.constant 0 : index
    %c0_26 = arith.constant 0 : index
    %44 = vector.load %arg3[%c0_25, %c0_26] : memref<10x1xf32, #tpu.memory_space<vmem>>, vector<10x1xf32>
    %45 = vector.broadcast %44 : vector<10x1xf32> to vector<10x256xf32>
    %46 = arith.addf %43, %45 : vector<10x256xf32>
    %cst_27 = arith.constant 0.000000e+00 : f32
    %47 = vector.broadcast %cst_27 : f32 to vector<10x256xf32>
    %48 = arith.maximumf %46, %47 : vector<10x256xf32>
    %cst_28 = arith.constant 0.000000e+00 : f32
    %49 = vector.broadcast %cst_28 : f32 to vector<10x256xf32>
    %50 = arith.select %23, %48, %49 : vector<10x256xi1>, vector<10x256xf32>
    %cst_29 = arith.constant 0.000000e+00 : f32
    %51 = vector.broadcast %cst_29 : f32 to vector<10x256xf32>
    %c0_30 = arith.constant 0 : index
    %c0_31 = arith.constant 0 : index
    %c0_32 = arith.constant 0 : index
    %c0_33 = arith.constant 0 : index
    %52 = vector.load %arg4[%c0_30, %c0_31, %c0_32, %c0_33] : memref<2x2x10x10xf32, #tpu.memory_space<vmem>>, vector<1x1x10x10xf32>
    %53 = vector.shape_cast %52 : vector<1x1x10x10xf32> to vector<10x10xf32>
    %c17_i32 = arith.constant 17 : i32
    %54 = tpu.dynamic_rotate %50 by %c17_i32 dim 1 : vector<10x256xf32>, i32 -> vector<10x256xf32>
    %cst_34 = arith.constant dense<0.000000e+00> : vector<10x256xf32>
    %55 = tpu.matmul %53, %54, %cst_34 {dimension_numbers = #tpu.dot_dimension_numbers<[1], [0], [0], [1], [0, 0, 1, 1], [], []>, precision = #tpu.contract_precision<fp32>} : vector<10x10xf32>, vector<10x256xf32>, vector<10x256xf32> -> vector<10x256xf32>
    %56 = arith.addf %51, %55 : vector<10x256xf32>
    %c0_35 = arith.constant 0 : index
    %c1_36 = arith.constant 1 : index
    %c0_37 = arith.constant 0 : index
    %c0_38 = arith.constant 0 : index
    %57 = vector.load %arg4[%c0_35, %c1_36, %c0_37, %c0_38] : memref<2x2x10x10xf32, #tpu.memory_space<vmem>>, vector<1x1x10x10xf32>
    %58 = vector.shape_cast %57 : vector<1x1x10x10xf32> to vector<10x10xf32>
    %c16_i32_39 = arith.constant 16 : i32
    %59 = tpu.dynamic_rotate %50 by %c16_i32_39 dim 1 : vector<10x256xf32>, i32 -> vector<10x256xf32>
    %cst_40 = arith.constant dense<0.000000e+00> : vector<10x256xf32>
    %60 = tpu.matmul %58, %59, %cst_40 {dimension_numbers = #tpu.dot_dimension_numbers<[1], [0], [0], [1], [0, 0, 1, 1], [], []>, precision = #tpu.contract_precision<fp32>} : vector<10x10xf32>, vector<10x256xf32>, vector<10x256xf32> -> vector<10x256xf32>
    %61 = arith.addf %56, %60 : vector<10x256xf32>
    %c1_41 = arith.constant 1 : index
    %c0_42 = arith.constant 0 : index
    %c0_43 = arith.constant 0 : index
    %c0_44 = arith.constant 0 : index
    %62 = vector.load %arg4[%c1_41, %c0_42, %c0_43, %c0_44] : memref<2x2x10x10xf32, #tpu.memory_space<vmem>>, vector<1x1x10x10xf32>
    %63 = vector.shape_cast %62 : vector<1x1x10x10xf32> to vector<10x10xf32>
    %c1_i32_45 = arith.constant 1 : i32
    %64 = tpu.dynamic_rotate %50 by %c1_i32_45 dim 1 : vector<10x256xf32>, i32 -> vector<10x256xf32>
    %cst_46 = arith.constant dense<0.000000e+00> : vector<10x256xf32>
    %65 = tpu.matmul %63, %64, %cst_46 {dimension_numbers = #tpu.dot_dimension_numbers<[1], [0], [0], [1], [0, 0, 1, 1], [], []>, precision = #tpu.contract_precision<fp32>} : vector<10x10xf32>, vector<10x256xf32>, vector<10x256xf32> -> vector<10x256xf32>
    %66 = arith.addf %61, %65 : vector<10x256xf32>
    %c1_47 = arith.constant 1 : index
    %c1_48 = arith.constant 1 : index
    %c0_49 = arith.constant 0 : index
    %c0_50 = arith.constant 0 : index
    %67 = vector.load %arg4[%c1_47, %c1_48, %c0_49, %c0_50] : memref<2x2x10x10xf32, #tpu.memory_space<vmem>>, vector<1x1x10x10xf32>
    %68 = vector.shape_cast %67 : vector<1x1x10x10xf32> to vector<10x10xf32>
    %cst_51 = arith.constant dense<0.000000e+00> : vector<10x256xf32>
    %69 = tpu.matmul %68, %50, %cst_51 {dimension_numbers = #tpu.dot_dimension_numbers<[1], [0], [0], [1], [0, 0, 1, 1], [], []>, precision = #tpu.contract_precision<fp32>} : vector<10x10xf32>, vector<10x256xf32>, vector<10x256xf32> -> vector<10x256xf32>
    %70 = arith.addf %66, %69 : vector<10x256xf32>
    %c0_52 = arith.constant 0 : index
    %c0_53 = arith.constant 0 : index
    %71 = vector.load %arg5[%c0_52, %c0_53] : memref<10x1xf32, #tpu.memory_space<vmem>>, vector<10x1xf32>
    %72 = vector.broadcast %71 : vector<10x1xf32> to vector<10x256xf32>
    %73 = arith.addf %70, %72 : vector<10x256xf32>
    %74 = arith.addf %73, %1 : vector<10x256xf32>
    %cst_54 = arith.constant 0.000000e+00 : f32
    %75 = vector.broadcast %cst_54 : f32 to vector<10x256xf32>
    %76 = arith.maximumf %74, %75 : vector<10x256xf32>
    %c0_55 = arith.constant 0 : index
    %c0_56 = arith.constant 0 : index
    %c0_57 = arith.constant 0 : index
    %77 = vector.load %arg6[%c0_55, %c0_56, %c0_57] : memref<1x10x256xf32, #tpu.memory_space<vmem>>, vector<1x10x256xf32>
    %78 = vector.shape_cast %77 : vector<1x10x256xf32> to vector<10x256xf32>
    %79 = vector.shape_cast %76 : vector<10x256xf32> to vector<1x10x256xf32>
    tpu.vector_store %arg6[%c0_55, %c0_56, %c0_57], %79 {strides = array<i32>} : memref<1x10x256xf32, #tpu.memory_space<vmem>>, vector<1x10x256xf32>,
    return
  }
  func.func @transform_0(%arg0: i32) -> (i32, i32, i32) {
    %c0_i32 = arith.constant 0 : i32
    %c0_i32_0 = arith.constant 0 : i32
    %c0_i32_1 = arith.constant 0 : i32
    return %arg0, %c0_i32, %c0_i32_0 : i32, i32, i32
  }
  func.func @transform_1(%arg0: i32) -> (i32, i32, i32, i32) {
    %c0_i32 = arith.constant 0 : i32
    %c0_i32_0 = arith.constant 0 : i32
    %c0_i32_1 = arith.constant 0 : i32
    %c0_i32_2 = arith.constant 0 : i32
    %c0_i32_3 = arith.constant 0 : i32
    return %c0_i32, %c0_i32_0, %c0_i32_1, %c0_i32_2 : i32, i32, i32, i32
  }
  func.func @transform_2(%arg0: i32) -> (i32, i32) {
    %c0_i32 = arith.constant 0 : i32
    %c0_i32_0 = arith.constant 0 : i32
    %c0_i32_1 = arith.constant 0 : i32
    return %c0_i32, %c0_i32_0 : i32, i32
  }
  func.func @transform_3(%arg0: i32) -> (i32, i32, i32, i32) {
    %c0_i32 = arith.constant 0 : i32
    %c0_i32_0 = arith.constant 0 : i32
    %c0_i32_1 = arith.constant 0 : i32
    %c0_i32_2 = arith.constant 0 : i32
    %c0_i32_3 = arith.constant 0 : i32
    return %c0_i32, %c0_i32_0, %c0_i32_1, %c0_i32_2 : i32, i32, i32, i32
  }
  func.func @transform_4(%arg0: i32) -> (i32, i32) {
    %c0_i32 = arith.constant 0 : i32
    %c0_i32_0 = arith.constant 0 : i32
    %c0_i32_1 = arith.constant 0 : i32
    return %c0_i32, %c0_i32_0 : i32, i32
  }
  func.func @transform_5(%arg0: i32) -> (i32, i32, i32) {
    %c0_i32 = arith.constant 0 : i32
    %c0_i32_0 = arith.constant 0 : i32
    %c0_i32_1 = arith.constant 0 : i32
    return %arg0, %c0_i32, %c0_i32_0 : i32, i32, i32
  }
}

</mosaic_0001>

<bundles_post_ra>
// kernel: resnet_block_forward.1
= control target key start
LH: loop header
LB: loop body
LE: loop exit
PB: predicated region body
PF: predicated region fallthrough
CT: control target
= control target key end

     0   :  { %s5372_s18 = smov 0   ;;  %s6050_s0 = inlined_call_operand.vmem [shape: f32[2,10,256], index: 0, kind: input, shape index: {}]   ;;  %s6051_s1 = inlined_call_operand.vmem [shape: f32[2,2,10,10], index: 1, kind: input, shape index: {}]   ;;  %s6052_s2 = inlined_call_operand.vmem [shape: f32[10,1], index: 2, kind: input, shape index: {}]   ;;  %s6053_s3 = inlined_call_operand.vmem [shape: f32[2,2,10,10], index: 3, kind: input, shape index: {}]   ;;  %s6054_s4 = inlined_call_operand.vmem [shape: f32[10,1], index: 4, kind: input, shape index: {}]   ;;  %s6055_s5 = inlined_call_operand.vmem [shape: f32[2,10,256], index: 5, kind: output, shape index: {}]  }
   0x1 LB: > { %s4903_s19 = sadd.s32 4294967295, %s5332_s18   ;;  %p4907_p0 = scmp.ge.s32.totalorder %s5332_s18, 1  ;;  %s5332_s18 = sphi %s5372_s18, %s15_s18  }
   0x2   : > { %p187_p1 = scmp.lt.s32.totalorder %s5332_s18, 3 }
   0x4   : > { %p188_p2 = pnand %p4907_p0, %p187_p1 }
   0x5   : > { %p215_p3 = scmp.lt.s32.totalorder (!%p188_p2), %s4903_s19, 1  ;;  %s5334_s24 = smov (!%p188_p2), 127   ;;  %v5335_v4 = vmov (!%p188_p2), 0.0   ;;  %v4912_v5 = vld [vmem:[%s6051_s1 + $0x10] sm:$0xff] (!%p188_p2)  ;;  %vm280_vm0 = vcmask (!%p188_p2), 80896   ;;  %v229_v8 = vlaneseq (!%p188_p2)  ;;  %vm287_vm2 = vcmask (!%p188_p2), 1041408  }
   0x6   : > { %191 = sbr.rel (%p188_p2) target bundleno = 1088 (0x440), region = 40  ;;  %362 = vmatprep.mubr.f32.mxu0 (!%p188_p2), %v5335_v4  ;;  %2665 = vmatprep.mubr.f32.mxu1 (!%p188_p2), %v5335_v4  ;;  %s5336_s25 = smov (!%p188_p2), 112   ;;  %v282_v6 = vsel (!%p188_p2), %vm280_vm0, %v4912_v5, 0  ;;  %v4913_v7 = vld [vmem:[%s6051_s1 + $0x18] sm:$0x3] (!%p188_p2) }
   0x7   : > { %s5337_s26 = smov (!%p188_p2), 111   ;;  %v5423_v9 = vand.u32 (!%p188_p2), 4294901760, %v282_v6  ;;  %v285_v10 = vsel (!%p188_p2), %vm280_vm0, %v4913_v7, 0  ;;  %v5426_v11 = vand.u32 (!%p188_p2), 127, %v229_v8  ;;  %s5340_s27 = smov (!%p188_p2), 17  }
   0x8   : > { %v5431_v13 = vand.u32 (!%p188_p2), 4294901760, %v285_v10  ;;  %s5341_s28 = smov (!%p188_p2), 1  }
   0x9   : > { %v5429_v12 = vsub.f32 (!%p188_p2), %v282_v6, %v5423_v9  ;;  %vm275_vm1 = vcmp.lt.s32.totalorder (!%p188_p2), %v5426_v11, 127  ;;  %vm1397_vm3 = vcmp.lt.s32.totalorder (!%p188_p2), %v5426_v11, 112  ;;  %vm1969_vm4 = vcmp.lt.s32.totalorder (!%p188_p2), %v5426_v11, 111 }
   0xa   : > { %v5436_v17 = vsub.f32 (!%p188_p2), %v285_v10, %v5431_v13  ;;  %vm2580_vm9 = vcmp.lt.s32.totalorder (!%p188_p2), %v5426_v11, 16  ;;  %vm2564_vm10 = vcmp.lt.s32.totalorder (!%p188_p2), %v5426_v11, 17  ;;  %vm3700_vm11 = vcmp.lt.s32.totalorder (!%p188_p2), %v5426_v11, 1 }
   0xb   : > { %v365_v16 = vand.u32 (!%p188_p2), 4294901760, %v5429_v12 }
   0xc   : > { %v376_v31 = vand.u32 (!%p188_p2), 4294901760, %v5436_v17 }
   0xd   : > { %s6061_s19 = smov (!%p215_p3, %s4903_s19), 1  ;;  %v366_v30 = vsub.f32 %v5429_v12, %v365_v16 }
   0xe   : > { %s4926_s20 = sshll.u32 %s6061_s19, 5  ;;  %v377_v43 = vsub.f32 %v5436_v17, %v376_v31 }
   0xf   : > { %s5388_s23 = scalar_lea.vmem %s6050_s0, %s4926_s20  ;;  %v367_v42 = vand.u32 4294901760, %v366_v30  ;;  %s224_s30 = scalar_lea.vmem %s6055_s5, %s4926_s20 }
  0x10   : > { %v5391_v0 = vld [vmem:[%s5388_s23 + $0x10] sm:$0x3]  ;;  %v5394_v1 = vld [vmem:[%s5388_s23] sm:$0xff]  ;;  %v5399_v2 = vld [vmem:[%s5388_s23 + $0x18] sm:$0x3]  ;;  %v378_v51 = vand.u32 4294901760, %v377_v43 }
  0x11   : > { %269 = vrot.lane.b32.xlu0 %v5391_v0, %s5334_s24  ;;  %267 = vrot.lane.b32.xlu1 %v5394_v1, %s5334_s24  ;;  %v5402_v3 = vld [vmem:[%s5388_s23 + $0x8] sm:$0xff]  ;;  %v844_v57 = vsel %vm287_vm2, %v5399_v2, 0  ;;  %v841_v63 = vsel %vm287_vm2, %v5391_v0, 0  ;;  %v848_v6 = vand.u32 4294901760, %v5394_v1 }
  0x12   : > { %v846_v59 = vand.u32 4294901760, %v5402_v3  ;;  %v850_v60 = vand.u32 4294901760, %v844_v57 }
  0x14   : > { %v5465_v61 = vsub.f32 %v5402_v3, %v846_v59  ;;  %v5467_v62 = vsub.f32 %v844_v57, %v850_v60 }
  0x15   : > { %273 = vrot.lane.b32.xlu0 %v5399_v2, %s5334_s24  ;;  %271 = vrot.lane.b32.xlu1 %v5402_v3, %s5334_s24 }
  0x16   : > { %v939_v8 = vand.u32 4294901760, %v5465_v61  ;;  %v951_v10 = vand.u32 4294901760, %v5467_v62 }
  0x19   : > { %1391 = vrot.lane.b32.xlu0 %v5391_v0, %s5336_s25  ;;  %1395 = vrot.lane.b32.xlu1 %v5399_v2, %s5336_s25 }
  0x1d   : > { %1389 = vrot.lane.b32.xlu0 %v5394_v1, %s5336_s25  ;;  %1393 = vrot.lane.b32.xlu1 %v5402_v3, %s5336_s25 }
  0x21   : > { %1963 = vrot.lane.b32.xlu0 %v5391_v0, %s5337_s26  ;;  %1967 = vrot.lane.b32.xlu1 %v5399_v2, %s5337_s26  ;;  %v262_v2 = vld [vmem:[%s6051_s1] sm:$0xff]  ;;  %v263_v0 = vld [vmem:[%s6051_s1 + $0x8] sm:$0x3] }
  0x22   : > { %v835_v7 = vsel %vm280_vm0, %v262_v2, 0 }
  0x25   : > { %1961 = vrot.lane.b32.xlu0 %v5394_v1, %s5337_s26  ;;  %1965 = vrot.lane.b32.xlu1 %v5402_v3, %s5337_s26  ;;  %v852_v3 = vand.u32 4294901760, %v841_v63  ;;  %s5339_s26 = smov 16  }
  0x83   : > { %v270_v14 = vpop.permute.xlu0 %269  ;;  %v268_v15 = vpop.permute.xlu1 %267 }
  0x87   : > { %v274_v18 = vpop.permute.xlu0 %273  ;;  %v272_v19 = vpop.permute.xlu1 %271 }
  0x88   : > { %v277_v20 = vsel %vm275_vm1, %v270_v14, %v274_v18  ;;  %v279_v21 = vsel %vm275_vm1, %v274_v18, %v270_v14  ;;  %v276_v22 = vsel %vm275_vm1, %v268_v15, %v272_v19  ;;  %v278_v23 = vsel %vm275_vm1, %v272_v19, %v268_v15 }
  0x89   : > { %v289_v24 = vsel %vm287_vm2, %v277_v20, 0  ;;  %v292_v25 = vsel %vm287_vm2, %v279_v21, 0  ;;  %v294_v26 = vand.u32 4294901760, %v278_v23  ;;  %v296_v27 = vand.u32 4294901760, %v276_v22 }
  0x8a   : > { %v298_v28 = vand.u32 4294901760, %v292_v25  ;;  %v300_v29 = vand.u32 4294901760, %v289_v24  ;;  %v5490_v14 = vsub.f32 %v5394_v1, %v848_v6  ;;  %v5492_v15 = vsub.f32 %v841_v63, %v852_v3 }
  0x8b   : > { %v386_v32 = vsub.f32 %v278_v23, %v294_v26  ;;  %v392_v33 = vsub.f32 %v276_v22, %v296_v27  ;;  %v5495_v18 = vpack.c.bf16 %v850_v60, %v846_v59  ;;  %v940_v19 = vsub.f32 %v5465_v61, %v939_v8 }
  0x8c   : > { %v398_v34 = vsub.f32 %v292_v25, %v298_v28  ;;  %v404_v35 = vsub.f32 %v289_v24, %v300_v29  ;;  %v4928_v36 = vpack.c.bf16 %v298_v28, %v294_v26  ;;  %v5444_v37 = vpack.c.bf16 %v300_v29, %v296_v27 }
  0x8d   : > { %v387_v38 = vand.u32 4294901760, %v386_v32  ;;  %v393_v39 = vand.u32 4294901760, %v392_v33  ;;  %v945_v21 = vand.u32 4294901760, %v5490_v14  ;;  %v957_v22 = vand.u32 4294901760, %v5492_v15 }
  0x8e   : > { %v399_v40 = vand.u32 4294901760, %v398_v34  ;;  %v405_v41 = vand.u32 4294901760, %v404_v35  ;;  %4929 = vmatprep.subr.bf16.mxu0 %v4928_v36  ;;  %v4936_v55 = vpack.c.bf16 %v398_v34, %v386_v32  ;;  %v4938_v56 = vpack.c.bf16 %v404_v35, %v392_v33 }
  0x8f   : > { %v394_v44 = vsub.f32 %v392_v33, %v393_v39  ;;  %4931 = vmatpush1.bf16.msra.mxu0 %v5444_v37  ;;  %v388_v45 = vsub.f32 %v386_v32, %v387_v38  ;;  %v941_v23 = vand.u32 4294901760, %v940_v19  ;;  %v5520_v27 = vpack.c.bf16 %v852_v3, %v848_v6 }
  0x90   : > { %v406_v46 = vsub.f32 %v404_v35, %v405_v41  ;;  %v400_v47 = vsub.f32 %v398_v34, %v399_v40  ;;  %v4944_v58 = vpack.c.bf16 %v399_v40, %v387_v38  ;;  %v4946_v5 = vpack.c.bf16 %v405_v41, %v393_v39  ;;  %v1392_v39 = vpop.permute.xlu0 %1391  ;;  %v1396_v40 = vpop.permute.xlu1 %1395 }
  0x91   : > { %v395_v48 = vand.u32 4294901760, %v394_v44  ;;  %v389_v49 = vand.u32 4294901760, %v388_v45  ;;  %v946_v28 = vsub.f32 %v5490_v14, %v945_v21  ;;  %v958_v29 = vsub.f32 %v5492_v15, %v957_v22  ;;  %v2530_v44 = vld [vmem:[%s6052_s2] sm:$0xff]  ;;  %v2531_v45 = vld [vmem:[%s6052_s2 + $0x8] sm:$0x3] }
  0x92   : > { %v407_v50 = vand.u32 4294901760, %v406_v46  ;;  %368 = vmatmul.mubr.f32.vlgmr.msra.gmra.mrb[0].mxu0 %v367_v42  ;;  %v401_v52 = vand.u32 4294901760, %v400_v47  ;;  %v1401_v41 = vsel %vm1397_vm3, %v1396_v40, %v1392_v39  ;;  %v5338_v46 = vmov 0  }
  0x93   : > { %373 = vmatprep.mubr.f32.mxu0 %v5335_v4  ;;  %v947_v33 = vand.u32 4294901760, %v946_v28  ;;  %v959_v34 = vand.u32 4294901760, %v958_v29  ;;  %5321 = vset.pattern.permute.xlu1 %v5338_v46  ;;  %v4968_v47 = vpack.c.bf16 %v951_v10, %v939_v8 }
  0x94   : > { %v4932_v53 = vpack.c.bf16 %v401_v52, %v389_v49  ;;  %v4934_v54 = vpack.c.bf16 %v407_v50, %v395_v48  ;;  %v1390_v42 = vpop.permute.xlu0 %1389  ;;  %v1394_v43 = vpop.permute.xlu1 %1393  ;;  %2534 = vperm.xlu1 %5321, %v2530_v44   ;;  %5320 = vset.pattern.permute.xlu0 %v5338_v46  ;;  %v1412_v48 = vsel %vm287_vm2, %v1401_v41, 0  ;;  %v1399_v52 = vsel %vm1397_vm3, %v1392_v39, %v1396_v40 }
  0x95   : > { %v1400_v49 = vsel %vm1397_vm3, %v1394_v43, %v1390_v42  ;;  %2539 = vperm.xlu0 %5320, %v2531_v45   ;;  %v1418_v50 = vand.u32 4294901760, %v1412_v48  ;;  %v1409_v57 = vsel %vm287_vm2, %v1399_v52, 0  ;;  %v4916_v45 = vld [vmem:[%s6051_s1 + $0x30] sm:$0xff]  ;;  %v4917_v52 = vld [vmem:[%s6051_s1 + $0x38] sm:$0x3] }
  0x96   : > { %379 = vmatmul.mubr.f32.gmra.mrb[2].mxu0 %v378_v51  ;;  %4933 = vmatprep.subr.bf16.mxu0 %v4932_v53  ;;  %v1414_v51 = vand.u32 4294901760, %v1400_v49  ;;  %v4970_v53 = vpack.c.bf16 %v957_v22, %v945_v21  ;;  %v1420_v63 = vand.u32 4294901760, %v1409_v57 }
  0x97   : > { %4935 = vmatpush1.bf16.msra.mxu0 %v4934_v54  ;;  %469 = vmatprep.mubr.f32.mxu0 %v5335_v4  ;;  %v5578_v54 = vsub.f32 %v1412_v48, %v1418_v50 }
  0x98   : > { %4937 = vmatprep.subr.bf16.mxu0 %v4936_v55  ;;  %v5580_v55 = vsub.f32 %v1400_v49, %v1414_v51  ;;  %v5604_v3 = vpack.c.bf16 %v1418_v50, %v1414_v51  ;;  %v5612_v8 = vsub.f32 %v1409_v57, %v1420_v63  ;;  %v1975_v49 = vsel %vm280_vm0, %v4916_v45, 0 }
  0x99   : > { %v1519_v60 = vand.u32 4294901760, %v5578_v54 }
  0x9a   : > { %471 = vmatmul.mubr.f32.vlgmr.msra.gmra.mrb[0].mxu0 %v5423_v9  ;;  %v1525_v19 = vand.u32 4294901760, %v5612_v8 }
  0x9b   : > { %4939 = vmatpush1.bf16.msra.mxu0 %v4938_v56  ;;  %476 = vmatprep.mubr.f32.mxu0 %v5335_v4  ;;  %v4914_v56 = vld [vmem:[%s6051_s1 + $0x20] sm:$0xff] }
  0x9c   : > { %4941 = vmatprep.subr.bf16.mxu0 %v4928_v36  ;;  %v1403_v59 = vsel %vm280_vm0, %v4914_v56, 0  ;;  %v1978_v56 = vsel %vm280_vm0, %v4917_v52, 0 }
  0x9e   : > { %478 = vmatmul.mubr.f32.gmra.mrb[2].mxu0 %v5431_v13 }
  0x9f   : > { %556 = vmatprep.mubr.f32.mxu0 %v5335_v4 }
  0xa2   : > { %559 = vmatmul.mubr.f32.vlgmr.msra.gmra.mrb[0].mxu0 %v5429_v12  ;;  %v5486_v12 = vand.u32 4294901760, %v835_v7 }
  0xa3   : > { %4943 = vmatpush1.bf16.msra.mxu0 %v5444_v37  ;;  %564 = vmatprep.mubr.f32.mxu0 %v5335_v4 }
  0xa4   : > { %4945 = vmatprep.subr.bf16.mxu0 %v4944_v58  ;;  %v5505_v20 = vsub.f32 %v835_v7, %v5486_v12  ;;  %v1398_v58 = vsel %vm1397_vm3, %v1390_v42, %v1394_v43 }
  0xa5   : > { %v1416_v2 = vand.u32 4294901760, %v1398_v58 }
  0xa6   : > { %567 = vmatmul.mubr.f32.gmra.mrb[2].mxu0 %v5436_v17  ;;  %v952_v17 = vsub.f32 %v5467_v62, %v951_v10  ;;  %v917_v25 = vand.u32 4294901760, %v5505_v20 }
  0xa7   : > { %641 = vmatprep.mubr.f32.mxu0 %v5335_v4  ;;  %v5614_v10 = vsub.f32 %v1398_v58, %v1416_v2  ;;  %v5632_v22 = vpack.c.bf16 %v1420_v63, %v1416_v2  ;;  %v5699_v63 = vand.u32 4294901760, %v1978_v56 }
  0xa8   : > { %v953_v24 = vand.u32 4294901760, %v952_v17 }
  0xa9   : > { %v1513_v17 = vand.u32 4294901760, %v5614_v10 }
  0xaa   : > { %645 = vmatmul.mubr.f32.vlgmr.msra.gmra.mrb[0].mxu0 %v365_v16  ;;  %v838_v16 = vsel %vm280_vm0, %v263_v0, 0  ;;  %v4956_v30 = vpack.c.bf16 %v953_v24, %v941_v23  ;;  %v1520_v0 = vsub.f32 %v5578_v54, %v1519_v60  ;;  %v1526_v24 = vsub.f32 %v5612_v8, %v1525_v19 }
  0xab   : > { %4947 = vmatpush1.bf16.msra.mxu0 %v4946_v5  ;;  %650 = vmatprep.mubr.f32.mxu0 %v5335_v4  ;;  %v5507_v1 = vand.u32 4294901760, %v838_v16  ;;  %v5600_v5 = vand.u32 4294901760, %v1403_v59  ;;  %v4994_v46 = vpack.c.bf16 %v1525_v19, %v1513_v17 }
  0xac   : > { %4949 = vmatprep.subr.bf16.mxu0 %v4928_v36  ;;  %v4958_v36 = vpack.c.bf16 %v959_v34, %v947_v33  ;;  %v1527_v28 = vand.u32 4294901760, %v1526_v24  ;;  %v1964_v34 = vpop.permute.xlu0 %1963 }
  0xad   : > { %v5517_v26 = vsub.f32 %v838_v16, %v5507_v1 }
  0xae   : > { %654 = vmatmul.mubr.f32.gmra.mrb[2].mxu0 %v376_v31  ;;  %v918_v31 = vsub.f32 %v5505_v20, %v917_v25 }
  0xaf   : > { %736 = vmatprep.mubr.f32.mxu0 %v5335_v4  ;;  %v928_v32 = vand.u32 4294901760, %v5517_v26 }
  0xb0   : > { %v919_v35 = vand.u32 4294901760, %v918_v31 }
  0xb2   : > { %738 = vmatmul.mubr.f32.vlgmr.msra.gmra.mrb[0].mxu0 %v5423_v9 }
  0xb3   : > { %4951 = vmatpush1.bf16.msra.mxu0 %v5444_v37  ;;  %743 = vmatprep.mubr.f32.mxu0 %v5335_v4  ;;  %v4960_v37 = vpack.c.bf16 %v5467_v62, %v5465_v61  ;;  %v1507_v61 = vand.u32 4294901760, %v5580_v55  ;;  %v4915_v62 = vld [vmem:[%s6051_s1 + $0x28] sm:$0x3] }
  0xb4   : > { %4953 = vmatprep.subr.bf16.mxu0 %v5495_v18  ;;  %v1406_v6 = vsel %vm280_vm0, %v4915_v62, 0 }
  0xb5   : > { %v1508_v7 = vsub.f32 %v5580_v55, %v1507_v61  ;;  %v4992_v39 = vpack.c.bf16 %v1519_v60, %v1507_v61 }
  0xb6   : > { %745 = vmatmul.mubr.f32.gmra.mrb[2].mxu0 %v5431_v13 }
  0xb7   : > { %819 = vmatprep.mubr.f32.mxu0 %v5335_v4  ;;  %v1509_v16 = vand.u32 4294901760, %v1508_v7 }
  0xba   : > { %821 = vmatmul.mubr.f32.vlgmr.msra.gmra.mrb[0].mxu0 %v5423_v9  ;;  %v929_v9 = vsub.f32 %v5517_v26, %v928_v32 }
  0xbb   : > { %826 = vmatprep.mubr.f32.mxu0 %v5335_v4  ;;  %4955 = vmatpush1.bf16.msra.mxu0 %v5520_v27 }
  0xbc   : > { %4957 = vmatprep.subr.bf16.mxu0 %v4956_v30  ;;  %v930_v38 = vand.u32 4294901760, %v929_v9 }
  0xbe   : > { %828 = vmatmul.mubr.f32.gmra.mrb[2].mxu0 %v5431_v13  ;;  %v4962_v13 = vpack.c.bf16 %v5492_v15, %v5490_v14  ;;  %v5618_v14 = vsub.f32 %v1403_v59, %v5600_v5  ;;  %v5620_v15 = vand.u32 4294901760, %v1406_v6 }
  0xbf   : > { %914 = vmatprep.mubr.f32.mxu0 %v5335_v4 }
  0xc0   : > { %v5630_v21 = vsub.f32 %v1406_v6, %v5620_v15 }
  0xc2   : > { %920 = vmatmul.mubr.f32.vlgmr.msra.gmra.mrb[0].mxu0 %v919_v35  ;;  %v4986_v35 = vpack.c.bf16 %v5612_v8, %v5614_v10  ;;  %v2067_v8 = vsub.f32 %v1978_v56, %v5699_v63 }
  0xc3   : > { %925 = vmatprep.mubr.f32.mxu0 %v5335_v4  ;;  %4959 = vmatpush1.bf16.msra.mxu0 %v4958_v36  ;;  %v1962_v36 = vpop.permute.xlu0 %1961 }
  0xc4   : > { %4961 = vmatprep.subr.bf16.mxu0 %v4960_v37 }
  0xc6   : > { %931 = vmatmul.mubr.f32.gmra.mrb[2].mxu0 %v930_v38 }
  0xc7   : > { %1021 = vmatprep.mubr.f32.mxu0 %v5335_v4 }
  0xca   : > { %1023 = vmatmul.mubr.f32.vlgmr.msra.gmra.mrb[0].mxu0 %v5486_v12 }
  0xcb   : > { %1028 = vmatprep.mubr.f32.mxu0 %v5335_v4  ;;  %4963 = vmatpush1.bf16.msra.mxu0 %v4962_v13 }
  0xcc   : > { %4965 = vmatprep.subr.bf16.mxu0 %v5495_v18 }
  0xce   : > { %1030 = vmatmul.mubr.f32.gmra.mrb[2].mxu0 %v5507_v1 }
  0xcf   : > { %1108 = vmatprep.mubr.f32.mxu0 %v5335_v4 }
  0xd2   : > { %1111 = vmatmul.mubr.f32.vlgmr.msra.gmra.mrb[0].mxu0 %v5505_v20  ;;  %v1485_v20 = vand.u32 4294901760, %v5618_v14 }
  0xd3   : > { %1116 = vmatprep.mubr.f32.mxu0 %v5335_v4  ;;  %4967 = vmatpush1.bf16.msra.mxu0 %v5520_v27 }
  0xd4   : > { %4969 = vmatprep.subr.bf16.mxu0 %v4968_v47 }
  0xd6   : > { %1119 = vmatmul.mubr.f32.gmra.mrb[2].mxu0 %v5517_v26  ;;  %v1486_v26 = vsub.f32 %v5618_v14, %v1485_v20 }
  0xd7   : > { %1193 = vmatprep.mubr.f32.mxu0 %v5335_v4 }
  0xd8   : > { %v1487_v30 = vand.u32 4294901760, %v1486_v26 }
  0xda   : > { %1197 = vmatmul.mubr.f32.vlgmr.msra.gmra.mrb[0].mxu0 %v917_v25  ;;  %v1514_v25 = vsub.f32 %v5614_v10, %v1513_v17  ;;  %v2068_v17 = vand.u32 4294901760, %v2067_v8 }
  0xdb   : > { %1202 = vmatprep.mubr.f32.mxu0 %v5335_v4  ;;  %4971 = vmatpush1.bf16.msra.mxu0 %v4970_v53 }
  0xdc   : > { %4973 = vmatprep.subr.bf16.mxu0 %v5495_v18  ;;  %v1521_v18 = vand.u32 4294901760, %v1520_v0  ;;  %v1515_v29 = vand.u32 4294901760, %v1514_v25 }
  0xde   : > { %1206 = vmatmul.mubr.f32.gmra.mrb[2].mxu0 %v928_v32  ;;  %v4980_v23 = vpack.c.bf16 %v1521_v18, %v1509_v16  ;;  %v4982_v32 = vpack.c.bf16 %v1527_v28, %v1515_v29  ;;  %v231_v28 = vadd.s32 128, %v5426_v11 }
  0xdf   : > { %1288 = vmatprep.mubr.f32.mxu0 %v5335_v4 }
  0xe0   : > { %v245_v29 = vand.u32 15, %v231_v28  ;;  %vm233_vm5 = vcmp.lt.s32.totalorder %v231_v28, 240 }
  0xe2   : > { %1290 = vmatmul.mubr.f32.vlgmr.msra.gmra.mrb[0].mxu0 %v5486_v12  ;;  %vm259_vm6 = vcmp.lt.s32.totalorder %v245_v29, 15 }
  0xe3   : > { %1295 = vmatprep.mubr.f32.mxu0 %v5335_v4  ;;  %4975 = vmatpush1.bf16.msra.mxu0 %v5520_v27  ;;  %v1496_v27 = vand.u32 4294901760, %v5630_v21  ;;  %vm5735_vm8 = vmand %vm233_vm5, %vm259_vm6 }
  0xe4   : > { %4977 = vmatprep.subr.bf16.mxu0 %v5604_v3 }
  0xe5   : > { %v1497_v31 = vsub.f32 %v5630_v21, %v1496_v27 }
  0xe6   : > { %1297 = vmatmul.mubr.f32.gmra.mrb[2].mxu0 %v5507_v1 }
  0xe7   : > { %1371 = vmatprep.mubr.f32.mxu0 %v5335_v4  ;;  %v1498_v33 = vand.u32 4294901760, %v1497_v31  ;;  %v238_v31 = vand.u32 15, %v5426_v11 }
  0xe9   : > { %vm5731_vm7 = vcmp.lt.s32.totalorder %v238_v31, 15 }
  0xea   : > { %1373 = vmatmul.mubr.f32.vlgmr.msra.gmra.mrb[0].mxu0 %v5486_v12  ;;  %v4984_v12 = vpack.c.bf16 %v5578_v54, %v5580_v55  ;;  %v5691_v55 = vand.u32 4294901760, %v1975_v49 }
  0xeb   : > { %4979 = vmatpush1.bf16.msra.mxu0 %v5632_v22  ;;  %1378 = vmatprep.mubr.f32.mxu0 %v5335_v4 }
  0xec   : > { %4981 = vmatprep.subr.bf16.mxu0 %v4980_v23  ;;  %v2056_v62 = vsub.f32 %v1975_v49, %v5691_v55  ;;  %v2069_v23 = vsub.f32 %v2067_v8, %v2068_v17 }
  0xee   : > { %1380 = vmatmul.mubr.f32.gmra.mrb[2].mxu0 %v5507_v1  ;;  %v1968_v1 = vpop.permute.xlu1 %1967  ;;  %v2057_v0 = vand.u32 4294901760, %v2056_v62 }
  0xef   : > { %1482 = vmatprep.mubr.f32.mxu0 %v5335_v4  ;;  %v1973_v9 = vsel %vm1969_vm4, %v1968_v1, %v1964_v34  ;;  %v1971_v42 = vsel %vm1969_vm4, %v1964_v34, %v1968_v1 }
  0xf0   : > { %v1984_v38 = vsel %vm287_vm2, %v1973_v9, 0  ;;  %v1981_v47 = vsel %vm287_vm2, %v1971_v42, 0  ;;  %v2058_v19 = vsub.f32 %v2056_v62, %v2057_v0 }
  0xf1   : > { %v1990_v40 = vand.u32 4294901760, %v1984_v38  ;;  %v1992_v53 = vand.u32 4294901760, %v1981_v47 }
  0xf2   : > { %1488 = vmatmul.mubr.f32.vlgmr.msra.gmra.mrb[0].mxu0 %v1487_v30  ;;  %v1966_v37 = vpop.permute.xlu1 %1965 }
  0xf3   : > { %4983 = vmatpush1.bf16.msra.mxu0 %v4982_v32  ;;  %1493 = vmatprep.mubr.f32.mxu0 %v5335_v4  ;;  %v1972_v13 = vsel %vm1969_vm4, %v1966_v37, %v1962_v36  ;;  %v5673_v43 = vsub.f32 %v1984_v38, %v1990_v40  ;;  %v1970_v48 = vsel %vm1969_vm4, %v1962_v36, %v1966_v37 }
  0xf4   : > { %4985 = vmatprep.subr.bf16.mxu0 %v4984_v12  ;;  %v1986_v41 = vand.u32 4294901760, %v1972_v13  ;;  %v1988_v54 = vand.u32 4294901760, %v1970_v48  ;;  %v2096_v60 = vsub.f32 %v1981_v47, %v1992_v53 }
  0xf5   : > { %v2091_v50 = vand.u32 4294901760, %v5673_v43 }
  0xf6   : > { %1499 = vmatmul.mubr.f32.gmra.mrb[2].mxu0 %v1498_v33  ;;  %v5675_v44 = vsub.f32 %v1972_v13, %v1986_v41  ;;  %v5000_v57 = vpack.c.bf16 %v1990_v40, %v1986_v41  ;;  %v2084_v61 = vsub.f32 %v1970_v48, %v1988_v54  ;;  %v5002_v10 = vpack.c.bf16 %v1992_v53, %v1988_v54 }
  0xf7   : > { %1589 = vmatprep.mubr.f32.mxu0 %v5335_v4  ;;  %v2092_v59 = vsub.f32 %v5673_v43, %v2091_v50 }
  0xf8   : > { %v2079_v51 = vand.u32 4294901760, %v5675_v44  ;;  %v2085_v7 = vand.u32 4294901760, %v2084_v61  ;;  %v5008_v25 = vpack.c.bf16 %v5673_v43, %v5675_v44  ;;  %v5010_v26 = vpack.c.bf16 %v2096_v60, %v2084_v61 }
  0xf9   : > { %v2093_v6 = vand.u32 4294901760, %v2092_v59 }
  0xfa   : > { %1591 = vmatmul.mubr.f32.vlgmr.msra.gmra.mrb[0].mxu0 %v5600_v5  ;;  %v2080_v58 = vsub.f32 %v5675_v44, %v2079_v51  ;;  %v2086_v18 = vsub.f32 %v2084_v61, %v2085_v7 }
  0xfb   : > { %4987 = vmatpush1.bf16.msra.mxu0 %v4986_v35  ;;  %1596 = vmatprep.mubr.f32.mxu0 %v5335_v4 }
  0xfc   : > { %4989 = vmatprep.subr.bf16.mxu0 %v5604_v3  ;;  %v2081_v2 = vand.u32 4294901760, %v2080_v58 }
  0xfe   : > { %1598 = vmatmul.mubr.f32.gmra.mrb[2].mxu0 %v5620_v15 }
  0xff   : > { %1676 = vmatprep.mubr.f32.mxu0 %v5335_v4 }
 0x102   : > { %1679 = vmatmul.mubr.f32.vlgmr.msra.gmra.mrb[0].mxu0 %v5618_v14  ;;  %v5004_v14 = vpack.c.bf16 %v2093_v6, %v2081_v2 }
 0x103   : > { %4991 = vmatpush1.bf16.msra.mxu0 %v5632_v22  ;;  %1684 = vmatprep.mubr.f32.mxu0 %v5335_v4 }
 0x104   : > { %4993 = vmatprep.subr.bf16.mxu0 %v4992_v39 }
 0x106   : > { %1687 = vmatmul.mubr.f32.gmra.mrb[2].mxu0 %v5630_v21  ;;  %v2087_v21 = vand.u32 4294901760, %v2086_v18 }
 0x107   : > { %1761 = vmatprep.mubr.f32.mxu0 %v5335_v4 }
 0x10a   : > { %1765 = vmatmul.mubr.f32.vlgmr.msra.gmra.mrb[0].mxu0 %v1485_v20 }
 0x10b   : > { %4995 = vmatpush1.bf16.msra.mxu0 %v4994_v46  ;;  %1770 = vmatprep.mubr.f32.mxu0 %v5335_v4 }
 0x10c   : > { %4997 = vmatprep.subr.bf16.mxu0 %v5604_v3  ;;  %v2097_v3 = vand.u32 4294901760, %v2096_v60 }
 0x10e   : > { %1774 = vmatmul.mubr.f32.gmra.mrb[2].mxu0 %v1496_v27  ;;  %v2098_v16 = vsub.f32 %v2096_v60, %v2097_v3  ;;  %v5018_v27 = vpack.c.bf16 %v2097_v3, %v2085_v7 }
 0x10f   : > { %1856 = vmatprep.mubr.f32.mxu0 %v5335_v4 }
 0x110   : > { %v2099_v20 = vand.u32 4294901760, %v2098_v16 }
 0x112   : > { %1858 = vmatmul.mubr.f32.vlgmr.msra.gmra.mrb[0].mxu0 %v5600_v5  ;;  %v5006_v24 = vpack.c.bf16 %v2099_v20, %v2087_v21  ;;  %v4820_v21 = vld [vmem:[%s6054_s4] sm:$0xff] }
 0x113   : > { %4999 = vmatpush1.bf16.msra.mxu0 %v5632_v22  ;;  %1863 = vmatprep.mubr.f32.mxu0 %v5335_v4  ;;  %v2059_v22 = vand.u32 4294901760, %v2058_v19  ;;  %v2535_v30 = vpop.permute.xlu1 %2534 }
 0x114   : > { %5001 = vmatprep.subr.bf16.mxu0 %v5000_v57  ;;  %v2540_v35 = vpop.permute.xlu0 %2539 }
 0x116   : > { %1865 = vmatmul.mubr.f32.gmra.mrb[2].mxu0 %v5620_v15 }
 0x117   : > { %1939 = vmatprep.mubr.f32.mxu0 %v5335_v4 }
 0x11a   : > { %1941 = vmatmul.mubr.f32.vlgmr.msra.gmra.mrb[0].mxu0 %v5600_v5  ;;  %v2070_v5 = vand.u32 4294901760, %v2069_v23  ;;  %v4918_v23 = vld [vmem:[%s6053_s3 + $0x10] sm:$0xff] }
 0x11b   : > { %5003 = vmatpush1.bf16.msra.mxu0 %v5002_v10  ;;  %1946 = vmatprep.mubr.f32.mxu0 %v5335_v4 }
 0x11c   : > { %5005 = vmatprep.subr.bf16.mxu0 %v5004_v14 }
 0x11e   : > { %1948 = vmatmul.mubr.f32.gmra.mrb[2].mxu0 %v5620_v15  ;;  %v5016_v15 = vpack.c.bf16 %v2091_v50, %v2079_v51 }
 0x11f   : > { %2054 = vmatprep.mubr.f32.mxu0 %v5335_v4 }
 0x122   : > { %2060 = vmatmul.mubr.f32.vlgmr.msra.gmra.mrb[0].mxu0 %v2059_v22  ;;  %v4821_v22 = vld [vmem:[%s6054_s4 + $0x8] sm:$0x3] }
 0x123   : > { %5007 = vmatpush1.bf16.msra.mxu0 %v5006_v24  ;;  %2065 = vmatprep.mubr.f32.mxu0 %v5335_v4  ;;  %v2586_v24 = vsel %vm280_vm0, %v4918_v23, 0 }
 0x124   : > { %5009 = vmatprep.subr.bf16.mxu0 %v5008_v25  ;;  %v4919_v25 = vld [vmem:[%s6053_s3 + $0x18] sm:$0x3] }
 0x126   : > { %2071 = vmatmul.mubr.f32.gmra.mrb[2].mxu0 %v2070_v5  ;;  %v5794_v5 = vand.u32 4294901760, %v2586_v24 }
 0x127   : > { %2161 = vmatprep.mubr.f32.mxu0 %v5335_v4 }
 0x12a   : > { %2163 = vmatmul.mubr.f32.vlgmr.msra.gmra.mrb[0].mxu0 %v5691_v55 }
 0x12b   : > { %5011 = vmatpush1.bf16.msra.mxu0 %v5010_v26  ;;  %2168 = vmatprep.mubr.f32.mxu0 %v5335_v4  ;;  %v2589_v26 = vsel %vm280_vm0, %v4919_v25, 0 }
 0x12c   : > { %5013 = vmatprep.subr.bf16.mxu0 %v5000_v57 }
 0x12e   : > { %2170 = vmatmul.mubr.f32.gmra.mrb[2].mxu0 %v5699_v63 }
 0x12f   : > { %2248 = vmatprep.mubr.f32.mxu0 %v5335_v4 }
 0x132   : > { %2251 = vmatmul.mubr.f32.vlgmr.msra.gmra.mrb[0].mxu0 %v2056_v62 }
 0x133   : > { %5015 = vmatpush1.bf16.msra.mxu0 %v5002_v10  ;;  %2256 = vmatprep.mubr.f32.mxu0 %v5335_v4 }
 0x134   : > { %5017 = vmatprep.subr.bf16.mxu0 %v5016_v15  ;;  %v5799_v15 = vsub.f32 %v2586_v24, %v5794_v5 }
 0x136   : > { %2259 = vmatmul.mubr.f32.gmra.mrb[2].mxu0 %v2067_v8 }
 0x137   : > { %2333 = vmatprep.mubr.f32.mxu0 %v5335_v4 }
 0x13a   : > { %2337 = vmatmul.mubr.f32.vlgmr.msra.gmra.mrb[0].mxu0 %v2057_v0 }
 0x13b   : > { %5019 = vmatpush1.bf16.msra.mxu0 %v5018_v27  ;;  %2342 = vmatprep.mubr.f32.mxu0 %v5335_v4  ;;  %v5801_v27 = vand.u32 4294901760, %v2589_v26 }
 0x13c   : > { %5021 = vmatprep.subr.bf16.mxu0 %v5000_v57 }
 0x13d   : > { %v5811_v34 = vsub.f32 %v2589_v26, %v5801_v27 }
 0x13e   : > { %2346 = vmatmul.mubr.f32.gmra.mrb[2].mxu0 %v2068_v17 }
 0x13f   : > { %2428 = vmatprep.mubr.f32.mxu0 %v5335_v4 }
 0x142   : > { %2430 = vmatmul.mubr.f32.vlgmr.msra.gmra.mrb[0].mxu0 %v5691_v55 }
 0x143   : > { %5023 = vmatpush1.bf16.msra.mxu0 %v5002_v10  ;;  %2435 = vmatprep.mubr.f32.mxu0 %v5335_v4 }
 0x146   : > { %2437 = vmatmul.mubr.f32.gmra.mrb[2].mxu0 %v5699_v63 }
 0x147   : > { %2511 = vmatprep.mubr.f32.mxu0 %v5335_v4 }
 0x14a   : > { %2513 = vmatmul.mubr.f32.vlgmr.msra.gmra.mrb[0].mxu0 %v5691_v55 }
 0x14b   : > { %2518 = vmatprep.mubr.f32.mxu0 %v5335_v4 }
 0x14e   : > { %2520 = vmatmul.mubr.f32.gmra.mrb[2].mxu0 %v5699_v63 }
 0x21d   : > { %v2514_v32 = vpop.f32.mrb[0].mxu0 }
 0x21e   : > { %v2542_v12 = vadd.f32 %v2535_v30, %v2514_v32  ;;  %v2516_v33 = vpop.f32.mrb[1].mxu0 }
 0x21f   : > { %v2543_v1 = vadd.f32 %v2535_v30, %v2516_v33  ;;  %v2668_v33 = vand.u32 4294901760, %v5799_v15 }
 0x220   : > { %v2546_v9 = vmax.f32 %v2542_v12, 0.0 }
 0x221   : > { %v2547_v37 = vmax.f32 %v2543_v1, 0.0  ;;  %v2521_v38 = vpop.f32.mrb[2].mxu0 }
 0x222   : > { %v2550_v13 = vsel %vm5731_vm7, %v2546_v9, 0.0  ;;  %v2544_v39 = vadd.f32 %v2540_v35, %v2521_v38  ;;  %v2523_v40 = vpop.f32.mrb[3].mxu0 }
 0x223   : > { %v4278_v41 = vand.u32 4294901760, %v2550_v13  ;;  %v2551_v42 = vsel %vm5735_vm8, %v2547_v37, 0.0  ;;  %v2545_v43 = vadd.f32 %v2540_v35, %v2523_v40 }
 0x224   : > { %v2548_v44 = vmax.f32 %v2544_v39, 0.0  ;;  %v4276_v45 = vand.u32 4294901760, %v2551_v42 }
 0x225   : > { %v5743_v46 = vsub.f32 %v2550_v13, %v4278_v41  ;;  %v2549_v47 = vmax.f32 %v2545_v43, 0.0  ;;  %v2679_v43 = vand.u32 4294901760, %v5811_v34 }
 0x226   : > { %v2552_v48 = vsel %vm5731_vm7, %v2548_v44, 0.0  ;;  %v5747_v49 = vsub.f32 %v2551_v42, %v4276_v45 }
 0x227   : > { %v4271_v50 = vsel %vm287_vm2, %v2552_v48, 0  ;;  %v2553_v51 = vsel %vm5735_vm8, %v2549_v47, 0.0  ;;  %2574 = vrot.lane.b32.xlu1 %v2552_v48, %s5339_s26  ;;  %v4375_v54 = vand.u32 4294901760, %v5743_v46 }
 0x228   : > { %v4282_v52 = vand.u32 4294901760, %v4271_v50  ;;  %2578 = vrot.lane.b32.xlu0 %v2553_v51, %s5339_s26  ;;  %v4274_v53 = vsel %vm287_vm2, %v2553_v51, 0  ;;  %v4369_v56 = vand.u32 4294901760, %v5747_v49 }
 0x229   : > { %v4280_v55 = vand.u32 4294901760, %v4274_v53  ;;  %v4376_v61 = vsub.f32 %v5743_v46, %v4375_v54 }
 0x22a   : > { %v5755_v57 = vsub.f32 %v4271_v50, %v4282_v52  ;;  %v5757_v58 = vpack.c.bf16 %v4282_v52, %v4278_v41  ;;  %v4370_v2 = vsub.f32 %v5747_v49, %v4369_v56 }
 0x22b   : > { %2572 = vrot.lane.b32.xlu1 %v2550_v13, %s5339_s26  ;;  %v5759_v59 = vpack.c.bf16 %v4280_v55, %v4276_v45  ;;  %v5761_v60 = vsub.f32 %v4274_v53, %v4280_v55  ;;  %v4377_v14 = vand.u32 4294901760, %v4376_v61  ;;  %v2680_v55 = vsub.f32 %v5811_v34, %v2679_v43 }
 0x22c   : > { %2576 = vrot.lane.b32.xlu0 %v2551_v42, %s5339_s26  ;;  %v4387_v62 = vand.u32 4294901760, %v5755_v57  ;;  %v5106_v63 = vpack.c.bf16 %v5755_v57, %v5743_v46  ;;  %v4371_v18 = vand.u32 4294901760, %v4370_v2 }
 0x22d   : > { %v4381_v6 = vand.u32 4294901760, %v5761_v60  ;;  %v5104_v3 = vpack.c.bf16 %v5761_v60, %v5747_v49 }
 0x22e   : > { %v4388_v7 = vsub.f32 %v5755_v57, %v4387_v62  ;;  %v5772_v0 = vpack.c.bf16 %v4387_v62, %v4375_v54 }
 0x22f   : > { %2558 = vrot.lane.b32.xlu1 %v2552_v48, %s5340_s27  ;;  %v4382_v8 = vsub.f32 %v5761_v60, %v4381_v6  ;;  %v5775_v10 = vpack.c.bf16 %v4381_v6, %v4369_v56  ;;  %v2681_v6 = vand.u32 4294901760, %v2680_v55 }
 0x230   : > { %2562 = vrot.lane.b32.xlu0 %v2553_v51, %s5340_s27  ;;  %v4389_v16 = vand.u32 4294901760, %v4388_v7 }
 0x231   : > { %v4383_v19 = vand.u32 4294901760, %v4382_v8 }
 0x232   : > { %v5777_v17 = vpack.c.bf16 %v4389_v16, %v4377_v14 }
 0x233   : > { %2556 = vrot.lane.b32.xlu1 %v2550_v13, %s5340_s27  ;;  %v5779_v20 = vpack.c.bf16 %v4383_v19, %v4371_v18 }
 0x234   : > { %2560 = vrot.lane.b32.xlu0 %v2551_v42, %s5340_s27 }
 0x237   : > { %3694 = vrot.lane.b32.xlu1 %v2552_v48, %s5341_s28 }
 0x238   : > { %3698 = vrot.lane.b32.xlu0 %v2553_v51, %s5341_s28 }
 0x23b   : > { %3692 = vrot.lane.b32.xlu1 %v2550_v13, %s5341_s28 }
 0x23c   : > { %3696 = vrot.lane.b32.xlu0 %v2551_v42, %s5341_s28  ;;  %v2669_v42 = vsub.f32 %v5799_v15, %v2668_v33 }
 0x23e   : > { %v2670_v54 = vand.u32 4294901760, %v2669_v42 }
 0x23f   : > { %4824 = vperm.xlu1 %5321, %v4820_v21  }
 0x240   : > { %4829 = vperm.xlu0 %5320, %v4821_v22  }
 0x299   : > { %v2575_v28 = vpop.permute.xlu1 %2574 }
 0x29a   : > { %v2579_v29 = vpop.permute.xlu0 %2578 }
 0x29b   : > { %v2582_v30 = vsel %vm2580_vm9, %v2575_v28, %v2579_v29  ;;  %v2584_v31 = vsel %vm2580_vm9, %v2579_v29, %v2575_v28 }
 0x29c   : > { %v2592_v32 = vsel %vm287_vm2, %v2584_v31, 0  ;;  %v2595_v12 = vsel %vm287_vm2, %v2582_v30, 0 }
 0x29d   : > { %v2601_v1 = vand.u32 4294901760, %v2595_v12  ;;  %v2603_v35 = vand.u32 4294901760, %v2592_v32  ;;  %v2573_v9 = vpop.permute.xlu1 %2572 }
 0x29e   : > { %v2577_v36 = vpop.permute.xlu0 %2576 }
 0x29f   : > { %v2701_v37 = vsub.f32 %v2595_v12, %v2601_v1  ;;  %v5813_v38 = vsub.f32 %v2592_v32, %v2603_v35  ;;  %v2581_v13 = vsel %vm2580_vm9, %v2573_v9, %v2577_v36  ;;  %v2583_v39 = vsel %vm2580_vm9, %v2577_v36, %v2573_v9 }
 0x2a0   : > { %v2597_v40 = vand.u32 4294901760, %v2581_v13  ;;  %v2599_v41 = vand.u32 4294901760, %v2583_v39 }
 0x2a1   : > { %v2702_v44 = vand.u32 4294901760, %v2701_v37  ;;  %v2708_v51 = vand.u32 4294901760, %v5813_v38  ;;  %v2559_v23 = vpop.permute.xlu1 %2558 }
 0x2a2   : > { %v2689_v45 = vsub.f32 %v2581_v13, %v2597_v40  ;;  %v2695_v47 = vsub.f32 %v2583_v39, %v2599_v41  ;;  %v5823_v48 = vpack.c.bf16 %v2601_v1, %v2597_v40  ;;  %v5825_v50 = vpack.c.bf16 %v2603_v35, %v2599_v41  ;;  %v2563_v24 = vpop.permute.xlu0 %2562  ;;  %v2554_v1 = vld [vmem:[%s6053_s3] sm:$0xff]  ;;  %v2555_v40 = vld [vmem:[%s6053_s3 + $0x8] sm:$0x3] }
 0x2a3   : > { %v2703_v56 = vsub.f32 %v2701_v37, %v2702_v44  ;;  %v2709_v2 = vsub.f32 %v5813_v38, %v2708_v51  ;;  %v2566_v28 = vsel %vm2564_vm10, %v2559_v23, %v2563_v24  ;;  %v2568_v35 = vsel %vm2564_vm10, %v2563_v24, %v2559_v23 }
 0x2a4   : > { %v2690_v52 = vand.u32 4294901760, %v2689_v45  ;;  %v2696_v53 = vand.u32 4294901760, %v2695_v47  ;;  %5025 = vmatprep.subr.bf16.mxu1 %v5823_v48  ;;  %v5032_v21 = vpack.c.bf16 %v2701_v37, %v2689_v45  ;;  %v5034_v22 = vpack.c.bf16 %v5813_v38, %v2695_v47 }
 0x2a5   : > { %5027 = vmatpush1.bf16.msra.mxu1 %v5825_v50  ;;  %v2704_v14 = vand.u32 4294901760, %v2703_v56  ;;  %v2710_v16 = vand.u32 4294901760, %v2709_v2  ;;  %v2557_v25 = vpop.permute.xlu1 %2556  ;;  %v3147_v31 = vsel %vm287_vm2, %v2566_v28, 0  ;;  %v3138_v38 = vsel %vm280_vm0, %v2554_v1, 0 }
 0x2a6   : > { %v2697_v61 = vsub.f32 %v2695_v47, %v2696_v53  ;;  %v2691_v62 = vsub.f32 %v2689_v45, %v2690_v52  ;;  %v2561_v26 = vpop.permute.xlu0 %2560  ;;  %v5040_v29 = vpack.c.bf16 %v2702_v44, %v2690_v52  ;;  %v3153_v12 = vand.u32 4294901760, %v3147_v31 }
 0x2a7   : > { %v2565_v30 = vsel %vm2564_vm10, %v2557_v25, %v2561_v26  ;;  %v5042_v9 = vpack.c.bf16 %v2708_v51, %v2696_v53  ;;  %v2567_v36 = vsel %vm2564_vm10, %v2561_v26, %v2557_v25  ;;  %v3144_v13 = vsel %vm287_vm2, %v2568_v35, 0 }
 0x2a8   : > { %2671 = vmatmul.mubr.f32.vlgmr.msra.gmra.mrb[0].mxu1 %v2670_v54  ;;  %v2698_v7 = vand.u32 4294901760, %v2697_v61  ;;  %v2692_v8 = vand.u32 4294901760, %v2691_v62  ;;  %v3149_v32 = vand.u32 4294901760, %v2565_v30  ;;  %v5867_v39 = vsub.f32 %v3147_v31, %v3153_v12 }
 0x2a9   : > { %2676 = vmatprep.mubr.f32.mxu1 %v5335_v4  ;;  %v3151_v41 = vand.u32 4294901760, %v2567_v36  ;;  %v3141_v44 = vsel %vm280_vm0, %v2555_v40, 0  ;;  %v3695_v25 = vpop.permute.xlu1 %3694 }
 0x2aa   : > { %v5028_v18 = vpack.c.bf16 %v2704_v14, %v2692_v8  ;;  %v5030_v19 = vpack.c.bf16 %v2710_v16, %v2698_v7  ;;  %v5860_v37 = vsub.f32 %v2565_v30, %v3149_v32  ;;  %v3254_v45 = vand.u32 4294901760, %v5867_v39  ;;  %v3699_v26 = vpop.permute.xlu0 %3698 }
 0x2ab   : > { %v5881_v47 = vsub.f32 %v2567_v36, %v3151_v41  ;;  %v5892_v51 = vand.u32 4294901760, %v3141_v44  ;;  %v3702_v30 = vsel %vm3700_vm11, %v3695_v25, %v3699_v26  ;;  %v3704_v36 = vsel %vm3700_vm11, %v3699_v26, %v3695_v25 }
 0x2ac   : > { %2682 = vmatmul.mubr.f32.gmra.mrb[2].mxu1 %v2681_v6  ;;  %5029 = vmatprep.subr.bf16.mxu1 %v5028_v18  ;;  %v3242_v42 = vand.u32 4294901760, %v5860_v37  ;;  %v3255_v53 = vsub.f32 %v5867_v39, %v3254_v45  ;;  %v5056_v23 = vpack.c.bf16 %v5867_v39, %v5860_v37  ;;  %v3712_v40 = vsel %vm287_vm2, %v3704_v36, 0 }
 0x2ad   : > { %2772 = vmatprep.mubr.f32.mxu1 %v5335_v4  ;;  %5031 = vmatpush1.bf16.msra.mxu1 %v5030_v19  ;;  %v3248_v54 = vand.u32 4294901760, %v5881_v47  ;;  %v5904_v61 = vsub.f32 %v3141_v44, %v5892_v51  ;;  %v3693_v28 = vpop.permute.xlu1 %3692 }
 0x2ae   : > { %5033 = vmatprep.subr.bf16.mxu1 %v5032_v21  ;;  %v5064_v31 = vpack.c.bf16 %v3254_v45, %v3242_v42  ;;  %v3723_v45 = vand.u32 4294901760, %v3712_v40 }
 0x2af   : > { %v3249_v6 = vsub.f32 %v5881_v47, %v3248_v54  ;;  %v3231_v14 = vand.u32 4294901760, %v5904_v61 }
 0x2b0   : > { %2774 = vmatmul.mubr.f32.vlgmr.msra.gmra.mrb[0].mxu1 %v5794_v5 }
 0x2b1   : > { %5035 = vmatpush1.bf16.msra.mxu1 %v5034_v22  ;;  %2779 = vmatprep.mubr.f32.mxu1 %v5335_v4  ;;  %v3250_v18 = vand.u32 4294901760, %v3249_v6  ;;  %v3232_v21 = vsub.f32 %v5904_v61, %v3231_v14 }
 0x2b2   : > { %5037 = vmatprep.subr.bf16.mxu1 %v5823_v48 }
 0x2b3   : > { %v3233_v24 = vand.u32 4294901760, %v3232_v21 }
 0x2b4   : > { %2781 = vmatmul.mubr.f32.gmra.mrb[2].mxu1 %v5801_v27 }
 0x2b5   : > { %2859 = vmatprep.mubr.f32.mxu1 %v5335_v4 }
 0x2b8   : > { %2862 = vmatmul.mubr.f32.vlgmr.msra.gmra.mrb[0].mxu1 %v5799_v15  ;;  %v5876_v15 = vand.u32 4294901760, %v3138_v38 }
 0x2b9   : > { %5039 = vmatpush1.bf16.msra.mxu1 %v5825_v50  ;;  %2867 = vmatprep.mubr.f32.mxu1 %v5335_v4 }
 0x2ba   : > { %5041 = vmatprep.subr.bf16.mxu1 %v5040_v29  ;;  %v3697_v29 = vpop.permute.xlu0 %3696 }
 0x2bc   : > { %2870 = vmatmul.mubr.f32.gmra.mrb[2].mxu1 %v5811_v34  ;;  %v3243_v34 = vsub.f32 %v5860_v37, %v3242_v42  ;;  %v4921_v42 = vld [vmem:[%s6053_s3 + $0x28] sm:$0x3] }
 0x2bd   : > { %2944 = vmatprep.mubr.f32.mxu1 %v5335_v4 }
 0x2be   : > { %v3244_v55 = vand.u32 4294901760, %v3243_v34  ;;  %v4825_v46 = vpop.permute.xlu1 %4824 }
 0x2c0   : > { %2948 = vmatmul.mubr.f32.vlgmr.msra.gmra.mrb[0].mxu1 %v2668_v33  ;;  %v3155_v33 = vand.u32 4294901760, %v3144_v13 }
 0x2c1   : > { %5043 = vmatpush1.bf16.msra.mxu1 %v5042_v9  ;;  %2953 = vmatprep.mubr.f32.mxu1 %v5335_v4  ;;  %v4920_v9 = vld [vmem:[%s6053_s3 + $0x20] sm:$0xff] }
 0x2c2   : > { %5045 = vmatprep.subr.bf16.mxu1 %v5823_v48  ;;  %v5884_v48 = vpack.c.bf16 %v3153_v12, %v3149_v32  ;;  %v5894_v52 = vsub.f32 %v3144_v13, %v3155_v33  ;;  %v5908_v2 = vpack.c.bf16 %v3155_v33, %v3151_v41  ;;  %v3701_v32 = vsel %vm3700_vm11, %v3693_v28, %v3697_v29 }
 0x2c3   : > { %v3715_v12 = vsel %vm287_vm2, %v3702_v30, 0  ;;  %v3717_v1 = vand.u32 4294901760, %v3701_v32  ;;  %v3706_v39 = vsel %vm280_vm0, %v4920_v9, 0 }
 0x2c4   : > { %2957 = vmatmul.mubr.f32.gmra.mrb[2].mxu1 %v2679_v43  ;;  %v5890_v43 = vsub.f32 %v3138_v38, %v5876_v15  ;;  %v3260_v62 = vand.u32 4294901760, %v5894_v52  ;;  %v3721_v35 = vand.u32 4294901760, %v3715_v12  ;;  %v3703_v38 = vsel %vm3700_vm11, %v3697_v29, %v3693_v28  ;;  %v4922_v28 = vld [vmem:[%s6053_s3 + $0x30] sm:$0xff] }
 0x2c5   : > { %3039 = vmatprep.mubr.f32.mxu1 %v5335_v4  ;;  %v5951_v13 = vsub.f32 %v3701_v32, %v3717_v1  ;;  %v3719_v11 = vand.u32 4294901760, %v3703_v38  ;;  %v5963_v44 = vand.u32 4294901760, %v3706_v39  ;;  %v4265_v30 = vsel %vm280_vm0, %v4922_v28, 0 }
 0x2c6   : > { %v3220_v56 = vand.u32 4294901760, %v5890_v43  ;;  %v3261_v16 = vsub.f32 %v5894_v52, %v3260_v62  ;;  %v5066_v37 = vpack.c.bf16 %v3260_v62, %v3248_v54  ;;  %v5956_v41 = vsub.f32 %v3715_v12, %v3721_v35 }
 0x2c7   : > { %v3810_v33 = vand.u32 4294901760, %v5951_v13  ;;  %v4345_v32 = vand.u32 4294901760, %v4265_v30 }
 0x2c8   : > { %3041 = vmatmul.mubr.f32.vlgmr.msra.gmra.mrb[0].mxu1 %v5794_v5  ;;  %v3221_v8 = vsub.f32 %v5890_v43, %v3220_v56  ;;  %v3262_v22 = vand.u32 4294901760, %v3261_v16  ;;  %v3822_v34 = vand.u32 4294901760, %v5956_v41 }
 0x2c9   : > { %5047 = vmatpush1.bf16.msra.mxu1 %v5825_v50  ;;  %3046 = vmatprep.mubr.f32.mxu1 %v5335_v4  ;;  %v3256_v50 = vand.u32 4294901760, %v3255_v53  ;;  %v3787_v53 = vsub.f32 %v3706_v39, %v5963_v44 }
 0x2ca   : > { %5049 = vmatprep.subr.bf16.mxu1 %v5884_v48  ;;  %v3222_v19 = vand.u32 4294901760, %v3221_v8 }
 0x2cb   : > { %v5052_v7 = vpack.c.bf16 %v3256_v50, %v3244_v55  ;;  %v3827_v55 = vsub.f32 %v3712_v40, %v3723_v45  ;;  %v3788_v50 = vand.u32 4294901760, %v3787_v53 }
 0x2cc   : > { %3048 = vmatmul.mubr.f32.gmra.mrb[2].mxu1 %v5801_v27 }
 0x2cd   : > { %3122 = vmatprep.mubr.f32.mxu1 %v5335_v4 }
 0x2d0   : > { %3124 = vmatmul.mubr.f32.vlgmr.msra.gmra.mrb[0].mxu1 %v5794_v5  ;;  %v5054_v5 = vpack.c.bf16 %v3262_v22, %v3250_v18  ;;  %v3789_v18 = vsub.f32 %v3787_v53, %v3788_v50 }
 0x2d1   : > { %5051 = vmatpush1.bf16.msra.mxu1 %v5908_v2  ;;  %3129 = vmatprep.mubr.f32.mxu1 %v5335_v4 }
 0x2d2   : > { %5053 = vmatprep.subr.bf16.mxu1 %v5052_v7  ;;  %v3828_v7 = vand.u32 4294901760, %v3827_v55 }
 0x2d4   : > { %3131 = vmatmul.mubr.f32.gmra.mrb[2].mxu1 %v5801_v27  ;;  %v5058_v27 = vpack.c.bf16 %v5894_v52, %v5881_v47  ;;  %v3709_v47 = vsel %vm280_vm0, %v4921_v42, 0  ;;  %v3811_v52 = vsub.f32 %v5951_v13, %v3810_v33  ;;  %v3829_v21 = vsub.f32 %v3827_v55, %v3828_v7 }
 0x2d5   : > { %3217 = vmatprep.mubr.f32.mxu1 %v5335_v4  ;;  %v5971_v54 = vand.u32 4294901760, %v3709_v47 }
 0x2d6   : > { %v3812_v62 = vand.u32 4294901760, %v3811_v52 }
 0x2d7   : > { %v3798_v6 = vsub.f32 %v3709_v47, %v5971_v54 }
 0x2d8   : > { %3223 = vmatmul.mubr.f32.vlgmr.msra.gmra.mrb[0].mxu1 %v3222_v19 }
 0x2d9   : > { %5055 = vmatpush1.bf16.msra.mxu1 %v5054_v5  ;;  %3228 = vmatprep.mubr.f32.mxu1 %v5335_v4  ;;  %v3799_v19 = vand.u32 4294901760, %v3798_v6  ;;  %v3790_v5 = vand.u32 4294901760, %v3789_v18 }
 0x2da   : > { %5057 = vmatprep.subr.bf16.mxu1 %v5056_v23 }
 0x2db   : > { %v3800_v23 = vsub.f32 %v3798_v6, %v3799_v19 }
 0x2dc   : > { %3234 = vmatmul.mubr.f32.gmra.mrb[2].mxu1 %v3233_v24  ;;  %v3830_v24 = vand.u32 4294901760, %v3829_v21 }
 0x2dd   : > { %3324 = vmatprep.mubr.f32.mxu1 %v5335_v4  ;;  %v3801_v25 = vand.u32 4294901760, %v3800_v23 }
 0x2e0   : > { %3326 = vmatmul.mubr.f32.vlgmr.msra.gmra.mrb[0].mxu1 %v5876_v15 }
 0x2e1   : > { %5059 = vmatpush1.bf16.msra.mxu1 %v5058_v27  ;;  %3331 = vmatprep.mubr.f32.mxu1 %v5335_v4 }
 0x2e2   : > { %5061 = vmatprep.subr.bf16.mxu1 %v5884_v48 }
 0x2e4   : > { %3333 = vmatmul.mubr.f32.gmra.mrb[2].mxu1 %v5892_v51 }
 0x2e5   : > { %3411 = vmatprep.mubr.f32.mxu1 %v5335_v4 }
 0x2e8   : > { %3414 = vmatmul.mubr.f32.vlgmr.msra.gmra.mrb[0].mxu1 %v5890_v43  ;;  %v3815_v43 = vsub.f32 %v3703_v38, %v3719_v11 }
 0x2e9   : > { %5063 = vmatpush1.bf16.msra.mxu1 %v5908_v2  ;;  %3419 = vmatprep.mubr.f32.mxu1 %v5335_v4 }
 0x2ea   : > { %5065 = vmatprep.subr.bf16.mxu1 %v5064_v31  ;;  %v5082_v26 = vpack.c.bf16 %v3827_v55, %v3815_v43  ;;  %v4923_v31 = vld [vmem:[%s6053_s3 + $0x38] sm:$0x3] }
 0x2eb   : > { %v4268_v12 = vsel %vm280_vm0, %v4923_v31, 0 }
 0x2ec   : > { %3422 = vmatmul.mubr.f32.gmra.mrb[2].mxu1 %v5904_v61  ;;  %v3816_v61 = vand.u32 4294901760, %v3815_v43 }
 0x2ed   : > { %3496 = vmatprep.mubr.f32.mxu1 %v5335_v4 }
 0x2ee   : > { %v3817_v16 = vsub.f32 %v3815_v43, %v3816_v61  ;;  %v5090_v29 = vpack.c.bf16 %v3828_v7, %v3816_v61 }
 0x2f0   : > { %3500 = vmatmul.mubr.f32.vlgmr.msra.gmra.mrb[0].mxu1 %v3220_v56  ;;  %v3823_v56 = vsub.f32 %v5956_v41, %v3822_v34  ;;  %v3818_v22 = vand.u32 4294901760, %v3817_v16 }
 0x2f1   : > { %5067 = vmatpush1.bf16.msra.mxu1 %v5066_v37  ;;  %3505 = vmatprep.mubr.f32.mxu1 %v5335_v4 }
 0x2f2   : > { %5069 = vmatprep.subr.bf16.mxu1 %v5884_v48  ;;  %v5072_v48 = vpack.c.bf16 %v3721_v35, %v3717_v1  ;;  %v3824_v8 = vand.u32 4294901760, %v3823_v56  ;;  %v5078_v27 = vpack.c.bf16 %v3830_v24, %v3818_v22  ;;  %v4346_v1 = vsub.f32 %v4265_v30, %v4345_v32 }
 0x2f3   : > { %v4356_v35 = vand.u32 4294901760, %v4268_v12 }
 0x2f4   : > { %3509 = vmatmul.mubr.f32.gmra.mrb[2].mxu1 %v3231_v14  ;;  %v5074_v14 = vpack.c.bf16 %v3723_v45, %v3719_v11  ;;  %v4347_v9 = vand.u32 4294901760, %v4346_v1  ;;  %v5325_v45 = vld [vmem:[%s5388_s23 + $0x18] sm:$0x3] }
 0x2f5   : > { %3591 = vmatprep.mubr.f32.mxu1 %v5335_v4  ;;  %v4357_v36 = vsub.f32 %v4268_v12, %v4356_v35 }
 0x2f6   : > { %v4348_v37 = vsub.f32 %v4346_v1, %v4347_v9 }
 0x2f7   : > { %v4358_v38 = vand.u32 4294901760, %v4357_v36 }
 0x2f8   : > { %3593 = vmatmul.mubr.f32.vlgmr.msra.gmra.mrb[0].mxu1 %v5876_v15 }
 0x2f9   : > { %5071 = vmatpush1.bf16.msra.mxu1 %v5908_v2  ;;  %3598 = vmatprep.mubr.f32.mxu1 %v5335_v4  ;;  %v5076_v2 = vpack.c.bf16 %v3824_v8, %v3812_v62  ;;  %v4359_v39 = vsub.f32 %v4357_v36, %v4358_v38 }
 0x2fa   : > { %5073 = vmatprep.subr.bf16.mxu1 %v5072_v48 }
 0x2fb   : > { %v4360_v40 = vand.u32 4294901760, %v4359_v39 }
 0x2fc   : > { %3600 = vmatmul.mubr.f32.gmra.mrb[2].mxu1 %v5892_v51 }
 0x2fd   : > { %3674 = vmatprep.mubr.f32.mxu1 %v5335_v4 }
 0x300   : > { %3676 = vmatmul.mubr.f32.vlgmr.msra.gmra.mrb[0].mxu1 %v5876_v15  ;;  %v5080_v15 = vpack.c.bf16 %v5956_v41, %v5951_v13  ;;  %v4349_v13 = vand.u32 4294901760, %v4348_v37 }
 0x301   : > { %5075 = vmatpush1.bf16.msra.mxu1 %v5074_v14  ;;  %3681 = vmatprep.mubr.f32.mxu1 %v5335_v4 }
 0x302   : > { %5077 = vmatprep.subr.bf16.mxu1 %v5076_v2 }
 0x304   : > { %3683 = vmatmul.mubr.f32.gmra.mrb[2].mxu1 %v5892_v51  ;;  %v5088_v51 = vpack.c.bf16 %v3822_v34, %v3810_v33  ;;  %v5324_v33 = vld [vmem:[%s5388_s23 + $0x10] sm:$0x3] }
 0x305   : > { %3785 = vmatprep.mubr.f32.mxu1 %v5335_v4 }
 0x308   : > { %3791 = vmatmul.mubr.f32.vlgmr.msra.gmra.mrb[0].mxu1 %v3790_v5 }
 0x309   : > { %5079 = vmatpush1.bf16.msra.mxu1 %v5078_v27  ;;  %3796 = vmatprep.mubr.f32.mxu1 %v5335_v4 }
 0x30a   : > { %5081 = vmatprep.subr.bf16.mxu1 %v5080_v15 }
 0x30c   : > { %3802 = vmatmul.mubr.f32.gmra.mrb[2].mxu1 %v3801_v25 }
 0x30d   : > { %3892 = vmatprep.mubr.f32.mxu1 %v5335_v4 }
 0x310   : > { %3894 = vmatmul.mubr.f32.vlgmr.msra.gmra.mrb[0].mxu1 %v5963_v44 }
 0x311   : > { %5083 = vmatpush1.bf16.msra.mxu1 %v5082_v26  ;;  %3899 = vmatprep.mubr.f32.mxu1 %v5335_v4 }
 0x312   : > { %5085 = vmatprep.subr.bf16.mxu1 %v5072_v48 }
 0x314   : > { %3901 = vmatmul.mubr.f32.gmra.mrb[2].mxu1 %v5971_v54 }
 0x315   : > { %3979 = vmatprep.mubr.f32.mxu1 %v5335_v4 }
 0x318   : > { %3982 = vmatmul.mubr.f32.vlgmr.msra.gmra.mrb[0].mxu1 %v3787_v53 }
 0x319   : > { %5087 = vmatpush1.bf16.msra.mxu1 %v5074_v14  ;;  %3987 = vmatprep.mubr.f32.mxu1 %v5335_v4 }
 0x31a   : > { %5089 = vmatprep.subr.bf16.mxu1 %v5088_v51 }
 0x31c   : > { %3990 = vmatmul.mubr.f32.gmra.mrb[2].mxu1 %v3798_v6 }
 0x31d   : > { %4064 = vmatprep.mubr.f32.mxu1 %v5335_v4 }
 0x320   : > { %4068 = vmatmul.mubr.f32.vlgmr.msra.gmra.mrb[0].mxu1 %v3788_v50 }
 0x321   : > { %5091 = vmatpush1.bf16.msra.mxu1 %v5090_v29  ;;  %4073 = vmatprep.mubr.f32.mxu1 %v5335_v4 }
 0x322   : > { %5093 = vmatprep.subr.bf16.mxu1 %v5072_v48 }
 0x324   : > { %4077 = vmatmul.mubr.f32.gmra.mrb[2].mxu1 %v3799_v19 }
 0x325   : > { %4159 = vmatprep.mubr.f32.mxu1 %v5335_v4 }
 0x328   : > { %4161 = vmatmul.mubr.f32.vlgmr.msra.gmra.mrb[0].mxu1 %v5963_v44 }
 0x329   : > { %5095 = vmatpush1.bf16.msra.mxu1 %v5074_v14  ;;  %4166 = vmatprep.mubr.f32.mxu1 %v5335_v4 }
 0x32a   : > { %5097 = vmatprep.subr.bf16.mxu1 %v5759_v59 }
 0x32c   : > { %4168 = vmatmul.mubr.f32.gmra.mrb[2].mxu1 %v5971_v54 }
 0x32d   : > { %4242 = vmatprep.mubr.f32.mxu1 %v5335_v4 }
 0x330   : > { %4244 = vmatmul.mubr.f32.vlgmr.msra.gmra.mrb[0].mxu1 %v5963_v44 }
 0x331   : > { %5099 = vmatpush1.bf16.msra.mxu1 %v5757_v58  ;;  %4249 = vmatprep.mubr.f32.mxu1 %v5335_v4 }
 0x332   : > { %5101 = vmatprep.subr.bf16.mxu1 %v5779_v20 }
 0x334   : > { %4251 = vmatmul.mubr.f32.gmra.mrb[2].mxu1 %v5971_v54 }
 0x335   : > { %4344 = vmatprep.mubr.f32.mxu1 %v5335_v4 }
 0x338   : > { %4350 = vmatmul.mubr.f32.vlgmr.msra.gmra.mrb[0].mxu1 %v4349_v13 }
 0x339   : > { %5103 = vmatpush1.bf16.msra.mxu1 %v5777_v17  ;;  %4355 = vmatprep.mubr.f32.mxu1 %v5335_v4 }
 0x33a   : > { %5105 = vmatprep.subr.bf16.mxu1 %v5104_v3 }
 0x33c   : > { %4361 = vmatmul.mubr.f32.gmra.mrb[2].mxu1 %v4360_v40 }
 0x33d   : > { %4451 = vmatprep.mubr.f32.mxu1 %v5335_v4 }
 0x340   : > { %4453 = vmatmul.mubr.f32.vlgmr.msra.gmra.mrb[0].mxu1 %v4345_v32 }
 0x341   : > { %5107 = vmatpush1.bf16.msra.mxu1 %v5106_v63  ;;  %4458 = vmatprep.mubr.f32.mxu1 %v5335_v4  ;;  %v5322_v63 = vld [vmem:[%s5388_s23] sm:$0xff] }
 0x342   : > { %5109 = vmatprep.subr.bf16.mxu1 %v5759_v59 }
 0x344   : > { %4460 = vmatmul.mubr.f32.gmra.mrb[2].mxu1 %v4356_v35 }
 0x345   : > { %4538 = vmatprep.mubr.f32.mxu1 %v5335_v4 }
 0x348   : > { %4541 = vmatmul.mubr.f32.vlgmr.msra.gmra.mrb[0].mxu1 %v4346_v1 }
 0x349   : > { %5111 = vmatpush1.bf16.msra.mxu1 %v5757_v58  ;;  %4546 = vmatprep.mubr.f32.mxu1 %v5335_v4 }
 0x34a   : > { %5113 = vmatprep.subr.bf16.mxu1 %v5775_v10 }
 0x34c   : > { %4549 = vmatmul.mubr.f32.gmra.mrb[2].mxu1 %v4357_v36 }
 0x34d   : > { %4623 = vmatprep.mubr.f32.mxu1 %v5335_v4 }
 0x350   : > { %4627 = vmatmul.mubr.f32.vlgmr.msra.gmra.mrb[0].mxu1 %v4347_v9 }
 0x351   : > { %5115 = vmatpush1.bf16.msra.mxu1 %v5772_v0  ;;  %4632 = vmatprep.mubr.f32.mxu1 %v5335_v4  ;;  %v5323_v0 = vld [vmem:[%s5388_s23 + $0x8] sm:$0xff] }
 0x352   : > { %5117 = vmatprep.subr.bf16.mxu1 %v5759_v59 }
 0x354   : > { %4636 = vmatmul.mubr.f32.gmra.mrb[2].mxu1 %v4358_v38 }
 0x355   : > { %4718 = vmatprep.mubr.f32.mxu1 %v5335_v4 }
 0x358   : > { %4720 = vmatmul.mubr.f32.vlgmr.msra.gmra.mrb[0].mxu1 %v4345_v32 }
 0x359   : > { %5119 = vmatpush1.bf16.msra.mxu1 %v5757_v58  ;;  %4725 = vmatprep.mubr.f32.mxu1 %v5335_v4  ;;  %v4830_v58 = vpop.permute.xlu0 %4829 }
 0x35c   : > { %4727 = vmatmul.mubr.f32.gmra.mrb[2].mxu1 %v4356_v35 }
 0x35d   : > { %4801 = vmatprep.mubr.f32.mxu1 %v5335_v4 }
 0x360   : > { %4803 = vmatmul.mubr.f32.vlgmr.msra.gmra.mrb[0].mxu1 %v4345_v32 }
 0x361   : > { %4808 = vmatprep.mubr.f32.mxu1 %v5335_v4 }
 0x364   : > { %4810 = vmatmul.mubr.f32.gmra.mrb[2].mxu1 %v4356_v35 }
 0x433   : > { %v4804_v49 = vpop.f32.mrb[0].mxu1 }
 0x434   : > { %v4832_v57 = vadd.f32 %v4825_v46, %v4804_v49  ;;  %v4806_v59 = vpop.f32.mrb[1].mxu1 }
 0x435   : > { %v4833_v60 = vadd.f32 %v4825_v46, %v4806_v59 }
 0x436   : > { %v4836_v3 = vadd.f32 %v5322_v63, %v4832_v57 }
 0x437   : > { %v4837_v10 = vadd.f32 %v5323_v0, %v4833_v60  ;;  %v4811_v17 = vpop.f32.mrb[2].mxu1 }
 0x438   : > { %v4840_v4 = vmax.f32 %v4836_v3, 0.0  ;;  %v4834_v20 = vadd.f32 %v4830_v58, %v4811_v17  ;;  %v4813_v41 = vpop.f32.mrb[3].mxu1 }
 0x439   : > { %v4841_v42 = vmax.f32 %v4837_v10, 0.0  ;;  %v4835_v11 = vadd.f32 %v4830_v58, %v4813_v41 }
 0x43a   : > { %4844 = vst [vmem:[%s224_s30] sm:$0xff] %v4840_v4  ;;  %v4838_v44 = vadd.f32 %v5324_v33, %v4834_v20 }
 0x43b   : > { %4845 = vst [vmem:[%s224_s30 + $0x8] sm:$0xff] %v4841_v42  ;;  %v4839_v47 = vadd.f32 %v5325_v45, %v4835_v11 }
 0x43c   : > { %v4842_v34 = vmax.f32 %v4838_v44, 0.0 }
 0x43d   : > { %v4843_v43 = vmax.f32 %v4839_v47, 0.0 }
 0x43e   : > { %4846 = vst [vmem:[%s224_s30 + $0x10] sm:$0x3] %v4842_v34 }
 0x43f   : > { %4847 = vst [vmem:[%s224_s30 + $0x18] sm:$0x3] %v4843_v43 }
 0x440 PF: > { %s15_s18 = sadd.s32 1, %s5332_s18  }
 0x441   : > { %p12_p4 = scmp.ge.s32.totalorder %s15_s18, 4  }
 0x443   :  { %14 = sbr.rel (!%p12_p4) target bundleno = 1 (0x1), region = 76 }

</bundles_post_ra>
